<compile_context>
chip_gen: v6e
topology: v6e:2x2x1
jax: 0.10.0
libtpu: 0.0.40
codegen_flags: <defaults>
</compile_context>

<pallas_src>
import jax
import jax.numpy as jnp
from jax import lax
from jax.experimental import pallas as pl
from jax.experimental.pallas import tpu as pltpu

NUM_GROUPS = 4
EPS = 1e-5


def _round_up(n, m):
    return ((n + m - 1) // m) * m


def _cdiv(a, b):
    return (a + b - 1) // b


def _classifier_kernel(x_ref, mdiv_ref, mtg1_ref, mtg2_ref,
                       w1_ref, b1_ref, be1_ref, a1_ref,
                       w2_ref, b2_ref, be2_ref, a2_ref,
                       w3_ref, b3_ref,
                       o_ref):
    """One batch tile of the full forward pass (weights resident in VMEM)."""
    mm_dtype = w1_ref.dtype          # bf16 (default) or f32 matmul operand dtype
    m_div = mdiv_ref[...]            # (Cp, G) membership with 1/group_size folded in

    def group_norm(h, mt_gamma, beta):
        # h: (TB, Cp) f32.  Padded channels have zero rows in m_div and zero
        # columns in mt_gamma, so they never perturb the statistics.
        mean_g = jnp.dot(h, m_div, preferred_element_type=jnp.float32)      # (TB, G)
        msq_g = jnp.dot(h * h, m_div, preferred_element_type=jnp.float32)   # (TB, G)
        var_g = jnp.maximum(msq_g - mean_g * mean_g, 0.0)                   # clamp cancellation
        scale_g = lax.rsqrt(var_g + EPS)                                    # (TB, G)
        # gamma is pre-folded into mt_gamma -> affine is one mul + one add.
        scale_c = jnp.dot(scale_g, mt_gamma, preferred_element_type=jnp.float32)
        shift_c = jnp.dot(-mean_g * scale_g, mt_gamma,
                          preferred_element_type=jnp.float32)
        return h * scale_c + (shift_c + beta)

    def prelu(h, alpha):
        # alpha is an SMEM scalar; PReLU(x) = x if x > 0 else alpha * x
        return jnp.where(h > 0.0, h, alpha * h)

    x = x_ref[...].astype(mm_dtype)

    # Block 1
    h = jnp.dot(x, w1_ref[...], preferred_element_type=jnp.float32) + b1_ref[...]
    h = prelu(group_norm(h, mtg1_ref[...], be1_ref[...]), a1_ref[0, 0])

    # Block 2
    h = jnp.dot(h.astype(mm_dtype), w2_ref[...],
                preferred_element_type=jnp.float32) + b2_ref[...]
    h = prelu(group_norm(h, mtg2_ref[...], be2_ref[...]), a2_ref[0, 0])

    # Output projection (lane-dense, padded emb dim -> unmasked stores)
    out = jnp.dot(h.astype(mm_dtype), w3_ref[...],
                  preferred_element_type=jnp.float32) + b3_ref[...]
    o_ref[...] = out.astype(o_ref.dtype)


def linear_classifier_forward(x, params, *, block_rows=1024,
                              matmul_dtype=jnp.bfloat16, out_dtype=None):
    """Batch-tiled pallas_call: x/out pipelined over a 1-D grid, weights resident."""
    (w1, b1, g1, be1, a1, w2, b2, g2, be2, a2, w3, b3) = params
    B, in_dim = x.shape
    latent_dim = w1.shape[1]
    emb_dim = w3.shape[1]
    assert latent_dim % NUM_GROUPS == 0, "latent_dim must be divisible by NUM_GROUPS"
    out_dtype = x.dtype if out_dtype is None else out_dtype

    # --- lane-dense channel padding (latent and emb to 128-lane multiples) ---
    lat_pad = _round_up(latent_dim, 128)
    emb_pad = _round_up(emb_dim, 128)
    dl = lat_pad - latent_dim
    de = emb_pad - emb_dim

    w1p = jnp.pad(w1, ((0, 0), (0, dl)))
    b1p = jnp.pad(b1, ((0, 0), (0, dl)))
    g1p = jnp.pad(g1, ((0, 0), (0, dl)))
    be1p = jnp.pad(be1, ((0, 0), (0, dl)))
    w2p = jnp.pad(w2, ((0, dl), (0, dl)))
    b2p = jnp.pad(b2, ((0, 0), (0, dl)))
    g2p = jnp.pad(g2, ((0, 0), (0, dl)))
    be2p = jnp.pad(be2, ((0, 0), (0, dl)))
    w3p = jnp.pad(w3, ((0, dl), (0, de)))
    b3p = jnp.pad(b3, ((0, 0), (0, de)))

    # --- group membership (1/group_size folded; padded channels -> no group),
    #     gamma folded into the per-layer broadcast-back matrices --------------
    gsize = latent_dim // NUM_GROUPS
    ch = jnp.arange(lat_pad, dtype=jnp.int32)
    grp = jnp.where(ch < latent_dim, ch // gsize, NUM_GROUPS)   # padded -> out of range
    m = (grp[:, None] == jnp.arange(NUM_GROUPS, dtype=jnp.int32)[None, :]
         ).astype(jnp.float32)                                  # (Cp, G)
    m_div = m / jnp.float32(gsize)                              # (Cp, G)
    m_t_g1 = m.T * g1p                                          # (G, Cp), gamma folded
    m_t_g2 = m.T * g2p

    # --- matmul operand dtype (bf16: ~2-4x MXU throughput, half weight VMEM) --
    w1p = w1p.astype(matmul_dtype)
    w2p = w2p.astype(matmul_dtype)
    w3p = w3p.astype(matmul_dtype)

    # --- batch tiling: adaptive TB (minimal padding), >=2 steps for megacore --
    steps = _cdiv(B, block_rows)
    if B >= 16:
        steps = max(steps, 2)
    TB = _round_up(_cdiv(B, steps), 8)

    # --- VMEM budget derived from chip capacity + actual operand sizes --------
    try:
        vmem_cap = int(pltpu.get_tpu_info().vmem_capacity_bytes)
    except Exception:
        vmem_cap = 64 * 1024 * 1024   # conservative (v7x-sized) fallback
    vmem_budget = int(vmem_cap * 0.875)

    wbytes = jnp.dtype(matmul_dtype).itemsize
    resident_bytes = (
        (w1p.size + w2p.size + w3p.size) * wbytes
        + (m_div.size + m_t_g1.size + m_t_g2.size) * 4
        + (b1p.size + be1p.size + b2p.size + be2p.size + b3p.size) * 4)

    def _estimate(tb):
        x_tile = tb * in_dim * x.dtype.itemsize
        o_tile = tb * emb_pad * jnp.dtype(out_dtype).itemsize
        scratch = 8 * tb * lat_pad * 4      # h, h*h, casts, scale/shift, ...
        return resident_bytes + 2 * (x_tile + o_tile) + scratch + (2 << 20)

    while _estimate(TB) > vmem_budget and TB > 8:
        TB = _round_up(TB // 2, 8)
    vmem_limit = int(min(max(_estimate(TB) * 2, 32 * 1024 * 1024), vmem_budget))

    Bp = _round_up(B, TB)
    xp = jnp.pad(x, ((0, Bp - B), (0, 0))) if Bp != B else x
    grid = (Bp // TB,)

    operands = (xp, m_div, m_t_g1, m_t_g2,
                w1p, b1p, be1p, a1,
                w2p, b2p, be2p, a2,
                w3p, b3p)

    def _run(single_buffer_weights):
        pipeline_mode = None
        if single_buffer_weights and hasattr(pl, "Buffered"):
            pipeline_mode = pl.Buffered(1)

        def resident(arr):
            ndim = arr.ndim

            def idx(i):
                return (0,) * ndim

            if pipeline_mode is not None:
                return pl.BlockSpec(arr.shape, idx, pipeline_mode=pipeline_mode)
            return pl.BlockSpec(arr.shape, idx)

        smem = pl.BlockSpec(memory_space=pltpu.MemorySpace.SMEM)

        in_specs = [
            pl.BlockSpec((TB, in_dim), lambda i: (i, 0)),   # x (pipelined)
            resident(m_div), resident(m_t_g1), resident(m_t_g2),
            resident(w1p), resident(b1p), resident(be1p), smem,   # a1 -> SMEM scalar
            resident(w2p), resident(b2p), resident(be2p), smem,   # a2 -> SMEM scalar
            resident(w3p), resident(b3p),
        ]

        return pl.pallas_call(
            _classifier_kernel,
            out_shape=jax.ShapeDtypeStruct((Bp, emb_pad), out_dtype),
            grid=grid,
            in_specs=in_specs,
            out_specs=pl.BlockSpec((TB, emb_pad), lambda i: (i, 0)),
            compiler_params=pltpu.CompilerParams(
                dimension_semantics=("parallel",),
                vmem_limit_bytes=vmem_limit,
            ),
        )(*operands)

    try:
        out = _run(True)          # single-buffered resident weights
    except Exception:
        out = _run(False)         # fallback: default (double-buffered) specs

    return out[:B, :emb_dim]


def init_params(key, in_dim, latent_dim, emb_dim):
    """Deterministic init mirroring torch defaults (uniform fan-in for Linear,
    gamma=1 / beta=0 for GroupNorm, alpha=0.25 for PReLU)."""
    ks = jax.random.split(key, 6)

    def linear(kw, kb, fan_in, fan_out):
        bound = 1.0 / jnp.sqrt(jnp.float32(fan_in))
        # Stored as (fan_in, fan_out) = W^T so the kernel does x @ W.
        w = jax.random.uniform(kw, (fan_in, fan_out), jnp.float32, -bound, bound)
        b = jax.random.uniform(kb, (1, fan_out), jnp.float32, -bound, bound)
        return w, b

    w1, b1 = linear(ks[0], ks[1], in_dim, latent_dim)
    w2, b2 = linear(ks[2], ks[3], latent_dim, latent_dim)
    w3, b3 = linear(ks[4], ks[5], latent_dim, emb_dim)

    g1 = jnp.ones((1, latent_dim), jnp.float32)
    be1 = jnp.zeros((1, latent_dim), jnp.float32)
    g2 = jnp.ones((1, latent_dim), jnp.float32)
    be2 = jnp.zeros((1, latent_dim), jnp.float32)
    a1 = jnp.full((1, 1), 0.25, jnp.float32)
    a2 = jnp.full((1, 1), 0.25, jnp.float32)

    return (w1, b1, g1, be1, a1, w2, b2, g2, be2, a2, w3, b3)


def reference_forward(x, params, matmul_dtype=jnp.float32):
    """Pure-JAX reference reproducing the PyTorch module semantics.  The
    matmul operands can be cast to matmul_dtype to mirror the kernel's
    bf16-operand / f32-accumulate matmuls (elementwise math stays f32)."""
    (w1, b1, g1, be1, a1, w2, b2, g2, be2, a2, w3, b3) = params

    def mm(a, w):
        return jnp.dot(a.astype(matmul_dtype), w.astype(matmul_dtype),
                       preferred_element_type=jnp.float32)

    def gn(h, gamma, beta):
        B, C = h.shape
        hg = h.reshape(B, NUM_GROUPS, C // NUM_GROUPS)
        mean = hg.mean(axis=-1, keepdims=True)
        var = hg.var(axis=-1, keepdims=True)  # biased, as in torch.nn.GroupNorm
        hn = ((hg - mean) / jnp.sqrt(var + EPS)).reshape(B, C)
        return hn * gamma + beta

    def prelu(h, a):
        return jnp.where(h > 0, h, a * h)

    h = mm(x, w1) + b1
    h = prelu(gn(h, g1, be1), a1)
    h = mm(h, w2) + b2
    h = prelu(gn(h, g2, be2), a2)
    return mm(h, w3) + b3


if __name__ == "__main__":
    in_dim, latent_dim, emb_dim = 32, 32, 16

    key = jax.random.PRNGKey(0)
    k_x, k_p, k_x2 = jax.random.split(key, 3)
    params = init_params(k_p, in_dim, latent_dim, emb_dim)

    # Tolerance note: kernel uses bf16 matmul operands with f32 accumulation
    # (flagged perf change); the reference mirrors that, so remaining diffs are
    # accumulation-order / variance-formula level plus occasional bf16 rounding
    # flips of intermediates.
    TOL = 1e-2

    # Case 1: small batch, single grid step.
    batch = 8
    x = jax.random.normal(k_x, (batch, in_dim), jnp.float32)
    out = jax.block_until_ready(linear_classifier_forward(x, params))
    ref = reference_forward(x, params, matmul_dtype=jnp.bfloat16)
    assert out.shape == (batch, emb_dim)
    assert jnp.allclose(out, ref, atol=TOL, rtol=TOL), "mismatch vs reference (case 1)"

    # Case 2: ragged batch with multiple grid steps (padding + >=2-step grid).
    batch2 = 20
    x2 = jax.random.normal(k_x2, (batch2, in_dim), jnp.float32)
    out2 = jax.block_until_ready(linear_classifier_forward(x2, params, block_rows=8))
    ref2 = reference_forward(x2, params, matmul_dtype=jnp.bfloat16)
    assert out2.shape == (batch2, emb_dim)
    assert jnp.allclose(out2, ref2, atol=TOL, rtol=TOL), "mismatch vs reference (case 2)"

    print("KERNEL_OK")
</pallas_src>

<mosaic_0001>
module attributes {stable_mosaic.version = 11 : i64} {
  func.func @_classifier_kernel(%arg0: i32, %arg1: memref<8x32xf32, #tpu.memory_space<vmem>>, %arg2: memref<128x4xf32, #tpu.memory_space<vmem>>, %arg3: memref<4x128xf32, #tpu.memory_space<vmem>>, %arg4: memref<4x128xf32, #tpu.memory_space<vmem>>, %arg5: memref<32x128xbf16, #tpu.memory_space<vmem>>, %arg6: memref<1x128xf32, #tpu.memory_space<vmem>>, %arg7: memref<1x128xf32, #tpu.memory_space<vmem>>, %arg8: memref<1x1xf32, #tpu.memory_space<smem>>, %arg9: memref<128x128xbf16, #tpu.memory_space<vmem>>, %arg10: memref<1x128xf32, #tpu.memory_space<vmem>>, %arg11: memref<1x128xf32, #tpu.memory_space<vmem>>, %arg12: memref<1x1xf32, #tpu.memory_space<smem>>, %arg13: memref<128x128xbf16, #tpu.memory_space<vmem>>, %arg14: memref<1x128xf32, #tpu.memory_space<vmem>>, %arg15: memref<8x128xf32, #tpu.memory_space<vmem>>) attributes {dimension_semantics = [#tpu.dimension_semantics<parallel>], iteration_bounds = array<i64: 1>, scalar_prefetch = 0 : i64, scratch_operands = 0 : i64, tpu.core_type = #tpu.core_type<tc>, window_params = [{transform_indices = @transform_0, window_bounds = array<i64: 8, 32>}, {pipeline_mode = #tpu.pipeline_mode<synchronous>, transform_indices = @transform_1, window_bounds = array<i64: 128, 4>}, {pipeline_mode = #tpu.pipeline_mode<synchronous>, transform_indices = @transform_2, window_bounds = array<i64: 4, 128>}, {pipeline_mode = #tpu.pipeline_mode<synchronous>, transform_indices = @transform_3, window_bounds = array<i64: 4, 128>}, {pipeline_mode = #tpu.pipeline_mode<synchronous>, transform_indices = @transform_4, window_bounds = array<i64: 32, 128>}, {pipeline_mode = #tpu.pipeline_mode<synchronous>, transform_indices = @transform_5, window_bounds = array<i64: 1, 128>}, {pipeline_mode = #tpu.pipeline_mode<synchronous>, transform_indices = @transform_6, window_bounds = array<i64: 1, 128>}, {transform_indices = @transform_7, window_bounds = array<i64: 1, 1>}, {pipeline_mode = #tpu.pipeline_mode<synchronous>, transform_indices = @transform_8, window_bounds = array<i64: 128, 128>}, {pipeline_mode = #tpu.pipeline_mode<synchronous>, transform_indices = @transform_9, window_bounds = array<i64: 1, 128>}, {pipeline_mode = #tpu.pipeline_mode<synchronous>, transform_indices = @transform_10, window_bounds = array<i64: 1, 128>}, {transform_indices = @transform_11, window_bounds = array<i64: 1, 1>}, {pipeline_mode = #tpu.pipeline_mode<synchronous>, transform_indices = @transform_12, window_bounds = array<i64: 128, 128>}, {pipeline_mode = #tpu.pipeline_mode<synchronous>, transform_indices = @transform_13, window_bounds = array<i64: 1, 128>}, {transform_indices = @transform_14, window_bounds = array<i64: 8, 128>}]} {
    %c0 = arith.constant 0 : index
    %c0_0 = arith.constant 0 : index
    %0 = vector.load %arg2[%c0, %c0_0] : memref<128x4xf32, #tpu.memory_space<vmem>>, vector<128x4xf32>
    %c0_1 = arith.constant 0 : index
    %c0_2 = arith.constant 0 : index
    %1 = vector.load %arg1[%c0_1, %c0_2] : memref<8x32xf32, #tpu.memory_space<vmem>>, vector<8x32xf32>
    %2 = arith.truncf %1 : vector<8x32xf32> to vector<8x32xbf16>
    %c0_3 = arith.constant 0 : index
    %c0_4 = arith.constant 0 : index
    %3 = vector.load %arg5[%c0_3, %c0_4] : memref<32x128xbf16, #tpu.memory_space<vmem>>, vector<32x128xbf16>
    %cst = arith.constant dense<0.000000e+00> : vector<8x128xf32>
    %4 = tpu.matmul %2, %3, %cst {dimension_numbers = #tpu.dot_dimension_numbers<[1], [0], [0], [1], [0, 0, 1, 1], [], []>} : vector<8x32xbf16>, vector<32x128xbf16>, vector<8x128xf32> -> vector<8x128xf32>
    %c0_5 = arith.constant 0 : index
    %c0_6 = arith.constant 0 : index
    %5 = vector.load %arg6[%c0_5, %c0_6] : memref<1x128xf32, #tpu.memory_space<vmem>>, vector<1x128xf32>
    %6 = vector.broadcast %5 : vector<1x128xf32> to vector<8x128xf32>
    %7 = arith.addf %4, %6 : vector<8x128xf32>
    %c0_7 = arith.constant 0 : index
    %c0_8 = arith.constant 0 : index
    %8 = vector.load %arg3[%c0_7, %c0_8] : memref<4x128xf32, #tpu.memory_space<vmem>>, vector<4x128xf32>
    %c0_9 = arith.constant 0 : index
    %c0_10 = arith.constant 0 : index
    %9 = vector.load %arg7[%c0_9, %c0_10] : memref<1x128xf32, #tpu.memory_space<vmem>>, vector<1x128xf32>
    %cst_11 = arith.constant dense<0.000000e+00> : vector<8x4xf32>
    %10 = tpu.matmul %7, %0, %cst_11 {dimension_numbers = #tpu.dot_dimension_numbers<[1], [0], [0], [1], [0, 0, 1, 1], [], []>} : vector<8x128xf32>, vector<128x4xf32>, vector<8x4xf32> -> vector<8x4xf32>
    %11 = arith.mulf %7, %7 : vector<8x128xf32>
    %cst_12 = arith.constant dense<0.000000e+00> : vector<8x4xf32>
    %12 = tpu.matmul %11, %0, %cst_12 {dimension_numbers = #tpu.dot_dimension_numbers<[1], [0], [0], [1], [0, 0, 1, 1], [], []>} : vector<8x128xf32>, vector<128x4xf32>, vector<8x4xf32> -> vector<8x4xf32>
    %13 = arith.mulf %10, %10 : vector<8x4xf32>
    %14 = arith.subf %12, %13 : vector<8x4xf32>
    %cst_13 = arith.constant 0.000000e+00 : f32
    %15 = vector.broadcast %cst_13 : f32 to vector<8x4xf32>
    %16 = arith.maximumf %14, %15 : vector<8x4xf32>
    %cst_14 = arith.constant 9.99999974E-6 : f32
    %17 = vector.broadcast %cst_14 : f32 to vector<8x4xf32>
    %18 = arith.addf %16, %17 : vector<8x4xf32>
    %19 = math.rsqrt %18 : vector<8x4xf32>
    %cst_15 = arith.constant dense<0.000000e+00> : vector<8x128xf32>
    %20 = tpu.matmul %19, %8, %cst_15 {dimension_numbers = #tpu.dot_dimension_numbers<[1], [0], [0], [1], [0, 0, 1, 1], [], []>} : vector<8x4xf32>, vector<4x128xf32>, vector<8x128xf32> -> vector<8x128xf32>
    %cst_16 = arith.constant 0.000000e+00 : f32
    %21 = vector.broadcast %cst_16 : f32 to vector<8x4xf32>
    %22 = arith.subf %21, %10 : vector<8x4xf32>
    %23 = arith.mulf %22, %19 : vector<8x4xf32>
    %cst_17 = arith.constant dense<0.000000e+00> : vector<8x128xf32>
    %24 = tpu.matmul %23, %8, %cst_17 {dimension_numbers = #tpu.dot_dimension_numbers<[1], [0], [0], [1], [0, 0, 1, 1], [], []>} : vector<8x4xf32>, vector<4x128xf32>, vector<8x128xf32> -> vector<8x128xf32>
    %25 = arith.mulf %7, %20 : vector<8x128xf32>
    %26 = vector.broadcast %9 : vector<1x128xf32> to vector<8x128xf32>
    %27 = arith.addf %24, %26 : vector<8x128xf32>
    %28 = arith.addf %25, %27 : vector<8x128xf32>
    %c0_18 = arith.constant 0 : index
    %c0_19 = arith.constant 0 : index
    %29 = memref.load %arg8[%c0_18, %c0_19] : memref<1x1xf32, #tpu.memory_space<smem>>
    %cst_20 = arith.constant 0.000000e+00 : f32
    %30 = vector.broadcast %cst_20 : f32 to vector<8x128xf32>
    %31 = arith.cmpf ogt, %28, %30 : vector<8x128xf32>
    %32 = vector.broadcast %29 : f32 to vector<8x128xf32>
    %33 = arith.mulf %32, %28 : vector<8x128xf32>
    %34 = arith.select %31, %28, %33 : vector<8x128xi1>, vector<8x128xf32>
    %35 = arith.truncf %34 : vector<8x128xf32> to vector<8x128xbf16>
    %c0_21 = arith.constant 0 : index
    %c0_22 = arith.constant 0 : index
    %36 = vector.load %arg9[%c0_21, %c0_22] : memref<128x128xbf16, #tpu.memory_space<vmem>>, vector<128x128xbf16>
    %cst_23 = arith.constant dense<0.000000e+00> : vector<8x128xf32>
    %37 = tpu.matmul %35, %36, %cst_23 {dimension_numbers = #tpu.dot_dimension_numbers<[1], [0], [0], [1], [0, 0, 1, 1], [], []>} : vector<8x128xbf16>, vector<128x128xbf16>, vector<8x128xf32> -> vector<8x128xf32>
    %c0_24 = arith.constant 0 : index
    %c0_25 = arith.constant 0 : index
    %38 = vector.load %arg10[%c0_24, %c0_25] : memref<1x128xf32, #tpu.memory_space<vmem>>, vector<1x128xf32>
    %39 = vector.broadcast %38 : vector<1x128xf32> to vector<8x128xf32>
    %40 = arith.addf %37, %39 : vector<8x128xf32>
    %c0_26 = arith.constant 0 : index
    %c0_27 = arith.constant 0 : index
    %41 = vector.load %arg4[%c0_26, %c0_27] : memref<4x128xf32, #tpu.memory_space<vmem>>, vector<4x128xf32>
    %c0_28 = arith.constant 0 : index
    %c0_29 = arith.constant 0 : index
    %42 = vector.load %arg11[%c0_28, %c0_29] : memref<1x128xf32, #tpu.memory_space<vmem>>, vector<1x128xf32>
    %cst_30 = arith.constant dense<0.000000e+00> : vector<8x4xf32>
    %43 = tpu.matmul %40, %0, %cst_30 {dimension_numbers = #tpu.dot_dimension_numbers<[1], [0], [0], [1], [0, 0, 1, 1], [], []>} : vector<8x128xf32>, vector<128x4xf32>, vector<8x4xf32> -> vector<8x4xf32>
    %44 = arith.mulf %40, %40 : vector<8x128xf32>
    %cst_31 = arith.constant dense<0.000000e+00> : vector<8x4xf32>
    %45 = tpu.matmul %44, %0, %cst_31 {dimension_numbers = #tpu.dot_dimension_numbers<[1], [0], [0], [1], [0, 0, 1, 1], [], []>} : vector<8x128xf32>, vector<128x4xf32>, vector<8x4xf32> -> vector<8x4xf32>
    %46 = arith.mulf %43, %43 : vector<8x4xf32>
    %47 = arith.subf %45, %46 : vector<8x4xf32>
    %cst_32 = arith.constant 0.000000e+00 : f32
    %48 = vector.broadcast %cst_32 : f32 to vector<8x4xf32>
    %49 = arith.maximumf %47, %48 : vector<8x4xf32>
    %cst_33 = arith.constant 9.99999974E-6 : f32
    %50 = vector.broadcast %cst_33 : f32 to vector<8x4xf32>
    %51 = arith.addf %49, %50 : vector<8x4xf32>
    %52 = math.rsqrt %51 : vector<8x4xf32>
    %cst_34 = arith.constant dense<0.000000e+00> : vector<8x128xf32>
    %53 = tpu.matmul %52, %41, %cst_34 {dimension_numbers = #tpu.dot_dimension_numbers<[1], [0], [0], [1], [0, 0, 1, 1], [], []>} : vector<8x4xf32>, vector<4x128xf32>, vector<8x128xf32> -> vector<8x128xf32>
    %cst_35 = arith.constant 0.000000e+00 : f32
    %54 = vector.broadcast %cst_35 : f32 to vector<8x4xf32>
    %55 = arith.subf %54, %43 : vector<8x4xf32>
    %56 = arith.mulf %55, %52 : vector<8x4xf32>
    %cst_36 = arith.constant dense<0.000000e+00> : vector<8x128xf32>
    %57 = tpu.matmul %56, %41, %cst_36 {dimension_numbers = #tpu.dot_dimension_numbers<[1], [0], [0], [1], [0, 0, 1, 1], [], []>} : vector<8x4xf32>, vector<4x128xf32>, vector<8x128xf32> -> vector<8x128xf32>
    %58 = arith.mulf %40, %53 : vector<8x128xf32>
    %59 = vector.broadcast %42 : vector<1x128xf32> to vector<8x128xf32>
    %60 = arith.addf %57, %59 : vector<8x128xf32>
    %61 = arith.addf %58, %60 : vector<8x128xf32>
    %c0_37 = arith.constant 0 : index
    %c0_38 = arith.constant 0 : index
    %62 = memref.load %arg12[%c0_37, %c0_38] : memref<1x1xf32, #tpu.memory_space<smem>>
    %cst_39 = arith.constant 0.000000e+00 : f32
    %63 = vector.broadcast %cst_39 : f32 to vector<8x128xf32>
    %64 = arith.cmpf ogt, %61, %63 : vector<8x128xf32>
    %65 = vector.broadcast %62 : f32 to vector<8x128xf32>
    %66 = arith.mulf %65, %61 : vector<8x128xf32>
    %67 = arith.select %64, %61, %66 : vector<8x128xi1>, vector<8x128xf32>
    %68 = arith.truncf %67 : vector<8x128xf32> to vector<8x128xbf16>
    %c0_40 = arith.constant 0 : index
    %c0_41 = arith.constant 0 : index
    %69 = vector.load %arg13[%c0_40, %c0_41] : memref<128x128xbf16, #tpu.memory_space<vmem>>, vector<128x128xbf16>
    %cst_42 = arith.constant dense<0.000000e+00> : vector<8x128xf32>
    %70 = tpu.matmul %68, %69, %cst_42 {dimension_numbers = #tpu.dot_dimension_numbers<[1], [0], [0], [1], [0, 0, 1, 1], [], []>} : vector<8x128xbf16>, vector<128x128xbf16>, vector<8x128xf32> -> vector<8x128xf32>
    %c0_43 = arith.constant 0 : index
    %c0_44 = arith.constant 0 : index
    %71 = vector.load %arg14[%c0_43, %c0_44] : memref<1x128xf32, #tpu.memory_space<vmem>>, vector<1x128xf32>
    %72 = vector.broadcast %71 : vector<1x128xf32> to vector<8x128xf32>
    %73 = arith.addf %70, %72 : vector<8x128xf32>
    %c0_45 = arith.constant 0 : index
    %c0_46 = arith.constant 0 : index
    %74 = vector.load %arg15[%c0_45, %c0_46] : memref<8x128xf32, #tpu.memory_space<vmem>>, vector<8x128xf32>
    tpu.vector_store %arg15[%c0_45, %c0_46], %73 {strides = array<i32>} : memref<8x128xf32, #tpu.memory_space<vmem>>, vector<8x128xf32>,
    return
  }
  func.func @transform_0(%arg0: i32) -> (i32, i32) {
    %c0_i32 = arith.constant 0 : i32
    %c0_i32_0 = arith.constant 0 : i32
    return %arg0, %c0_i32 : i32, i32
  }
  func.func @transform_1(%arg0: i32) -> (i32, i32) {
    %c0_i32 = arith.constant 0 : i32
    %c0_i32_0 = arith.constant 0 : i32
    %c0_i32_1 = arith.constant 0 : i32
    return %c0_i32, %c0_i32_0 : i32, i32
  }
  func.func @transform_2(%arg0: i32) -> (i32, i32) {
    %c0_i32 = arith.constant 0 : i32
    %c0_i32_0 = arith.constant 0 : i32
    %c0_i32_1 = arith.constant 0 : i32
    return %c0_i32, %c0_i32_0 : i32, i32
  }
  func.func @transform_3(%arg0: i32) -> (i32, i32) {
    %c0_i32 = arith.constant 0 : i32
    %c0_i32_0 = arith.constant 0 : i32
    %c0_i32_1 = arith.constant 0 : i32
    return %c0_i32, %c0_i32_0 : i32, i32
  }
  func.func @transform_4(%arg0: i32) -> (i32, i32) {
    %c0_i32 = arith.constant 0 : i32
    %c0_i32_0 = arith.constant 0 : i32
    %c0_i32_1 = arith.constant 0 : i32
    return %c0_i32, %c0_i32_0 : i32, i32
  }
  func.func @transform_5(%arg0: i32) -> (i32, i32) {
    %c0_i32 = arith.constant 0 : i32
    %c0_i32_0 = arith.constant 0 : i32
    %c0_i32_1 = arith.constant 0 : i32
    return %c0_i32, %c0_i32_0 : i32, i32
  }
  func.func @transform_6(%arg0: i32) -> (i32, i32) {
    %c0_i32 = arith.constant 0 : i32
    %c0_i32_0 = arith.constant 0 : i32
    %c0_i32_1 = arith.constant 0 : i32
    return %c0_i32, %c0_i32_0 : i32, i32
  }
  func.func @transform_7(%arg0: i32) -> (i32, i32) {
    %c0_i32 = arith.constant 0 : i32
    %c0_i32_0 = arith.constant 0 : i32
    %c0_i32_1 = arith.constant 0 : i32
    return %c0_i32, %c0_i32_0 : i32, i32
  }
  func.func @transform_8(%arg0: i32) -> (i32, i32) {
    %c0_i32 = arith.constant 0 : i32
    %c0_i32_0 = arith.constant 0 : i32
    %c0_i32_1 = arith.constant 0 : i32
    return %c0_i32, %c0_i32_0 : i32, i32
  }
  func.func @transform_9(%arg0: i32) -> (i32, i32) {
    %c0_i32 = arith.constant 0 : i32
    %c0_i32_0 = arith.constant 0 : i32
    %c0_i32_1 = arith.constant 0 : i32
    return %c0_i32, %c0_i32_0 : i32, i32
  }
  func.func @transform_10(%arg0: i32) -> (i32, i32) {
    %c0_i32 = arith.constant 0 : i32
    %c0_i32_0 = arith.constant 0 : i32
    %c0_i32_1 = arith.constant 0 : i32
    return %c0_i32, %c0_i32_0 : i32, i32
  }
  func.func @transform_11(%arg0: i32) -> (i32, i32) {
    %c0_i32 = arith.constant 0 : i32
    %c0_i32_0 = arith.constant 0 : i32
    %c0_i32_1 = arith.constant 0 : i32
    return %c0_i32, %c0_i32_0 : i32, i32
  }
  func.func @transform_12(%arg0: i32) -> (i32, i32) {
    %c0_i32 = arith.constant 0 : i32
    %c0_i32_0 = arith.constant 0 : i32
    %c0_i32_1 = arith.constant 0 : i32
    return %c0_i32, %c0_i32_0 : i32, i32
  }
  func.func @transform_13(%arg0: i32) -> (i32, i32) {
    %c0_i32 = arith.constant 0 : i32
    %c0_i32_0 = arith.constant 0 : i32
    %c0_i32_1 = arith.constant 0 : i32
    return %c0_i32, %c0_i32_0 : i32, i32
  }
  func.func @transform_14(%arg0: i32) -> (i32, i32) {
    %c0_i32 = arith.constant 0 : i32
    %c0_i32_0 = arith.constant 0 : i32
    return %arg0, %c0_i32 : i32, i32
  }
}

module attributes {stable_mosaic.version = 11 : i64} {
  func.func @_classifier_kernel(%arg0: i32, %arg1: memref<8x32xf32, #tpu.memory_space<vmem>>, %arg2: memref<128x4xf32, #tpu.memory_space<vmem>>, %arg3: memref<4x128xf32, #tpu.memory_space<vmem>>, %arg4: memref<4x128xf32, #tpu.memory_space<vmem>>, %arg5: memref<32x128xbf16, #tpu.memory_space<vmem>>, %arg6: memref<1x128xf32, #tpu.memory_space<vmem>>, %arg7: memref<1x128xf32, #tpu.memory_space<vmem>>, %arg8: memref<1x1xf32, #tpu.memory_space<smem>>, %arg9: memref<128x128xbf16, #tpu.memory_space<vmem>>, %arg10: memref<1x128xf32, #tpu.memory_space<vmem>>, %arg11: memref<1x128xf32, #tpu.memory_space<vmem>>, %arg12: memref<1x1xf32, #tpu.memory_space<smem>>, %arg13: memref<128x128xbf16, #tpu.memory_space<vmem>>, %arg14: memref<1x128xf32, #tpu.memory_space<vmem>>, %arg15: memref<8x128xf32, #tpu.memory_space<vmem>>) attributes {dimension_semantics = [#tpu.dimension_semantics<parallel>], iteration_bounds = array<i64: 1>, scalar_prefetch = 0 : i64, scratch_operands = 0 : i64, tpu.core_type = #tpu.core_type<tc>, window_params = [{transform_indices = @transform_0, window_bounds = array<i64: 8, 32>}, {pipeline_mode = #tpu.pipeline_mode<synchronous>, transform_indices = @transform_1, window_bounds = array<i64: 128, 4>}, {pipeline_mode = #tpu.pipeline_mode<synchronous>, transform_indices = @transform_2, window_bounds = array<i64: 4, 128>}, {pipeline_mode = #tpu.pipeline_mode<synchronous>, transform_indices = @transform_3, window_bounds = array<i64: 4, 128>}, {pipeline_mode = #tpu.pipeline_mode<synchronous>, transform_indices = @transform_4, window_bounds = array<i64: 32, 128>}, {pipeline_mode = #tpu.pipeline_mode<synchronous>, transform_indices = @transform_5, window_bounds = array<i64: 1, 128>}, {pipeline_mode = #tpu.pipeline_mode<synchronous>, transform_indices = @transform_6, window_bounds = array<i64: 1, 128>}, {transform_indices = @transform_7, window_bounds = array<i64: 1, 1>}, {pipeline_mode = #tpu.pipeline_mode<synchronous>, transform_indices = @transform_8, window_bounds = array<i64: 128, 128>}, {pipeline_mode = #tpu.pipeline_mode<synchronous>, transform_indices = @transform_9, window_bounds = array<i64: 1, 128>}, {pipeline_mode = #tpu.pipeline_mode<synchronous>, transform_indices = @transform_10, window_bounds = array<i64: 1, 128>}, {transform_indices = @transform_11, window_bounds = array<i64: 1, 1>}, {pipeline_mode = #tpu.pipeline_mode<synchronous>, transform_indices = @transform_12, window_bounds = array<i64: 128, 128>}, {pipeline_mode = #tpu.pipeline_mode<synchronous>, transform_indices = @transform_13, window_bounds = array<i64: 1, 128>}, {transform_indices = @transform_14, window_bounds = array<i64: 8, 128>}]} {
    %c0 = arith.constant 0 : index
    %c0_0 = arith.constant 0 : index
    %0 = vector.load %arg2[%c0, %c0_0] : memref<128x4xf32, #tpu.memory_space<vmem>>, vector<128x4xf32>
    %c0_1 = arith.constant 0 : index
    %c0_2 = arith.constant 0 : index
    %1 = vector.load %arg1[%c0_1, %c0_2] : memref<8x32xf32, #tpu.memory_space<vmem>>, vector<8x32xf32>
    %2 = arith.truncf %1 : vector<8x32xf32> to vector<8x32xbf16>
    %c0_3 = arith.constant 0 : index
    %c0_4 = arith.constant 0 : index
    %3 = vector.load %arg5[%c0_3, %c0_4] : memref<32x128xbf16, #tpu.memory_space<vmem>>, vector<32x128xbf16>
    %cst = arith.constant dense<0.000000e+00> : vector<8x128xf32>
    %4 = tpu.matmul %2, %3, %cst {dimension_numbers = #tpu.dot_dimension_numbers<[1], [0], [0], [1], [0, 0, 1, 1], [], []>} : vector<8x32xbf16>, vector<32x128xbf16>, vector<8x128xf32> -> vector<8x128xf32>
    %c0_5 = arith.constant 0 : index
    %c0_6 = arith.constant 0 : index
    %5 = vector.load %arg6[%c0_5, %c0_6] : memref<1x128xf32, #tpu.memory_space<vmem>>, vector<1x128xf32>
    %6 = vector.broadcast %5 : vector<1x128xf32> to vector<8x128xf32>
    %7 = arith.addf %4, %6 : vector<8x128xf32>
    %c0_7 = arith.constant 0 : index
    %c0_8 = arith.constant 0 : index
    %8 = vector.load %arg3[%c0_7, %c0_8] : memref<4x128xf32, #tpu.memory_space<vmem>>, vector<4x128xf32>
    %c0_9 = arith.constant 0 : index
    %c0_10 = arith.constant 0 : index
    %9 = vector.load %arg7[%c0_9, %c0_10] : memref<1x128xf32, #tpu.memory_space<vmem>>, vector<1x128xf32>
    %cst_11 = arith.constant dense<0.000000e+00> : vector<8x4xf32>
    %10 = tpu.matmul %7, %0, %cst_11 {dimension_numbers = #tpu.dot_dimension_numbers<[1], [0], [0], [1], [0, 0, 1, 1], [], []>} : vector<8x128xf32>, vector<128x4xf32>, vector<8x4xf32> -> vector<8x4xf32>
    %11 = arith.mulf %7, %7 : vector<8x128xf32>
    %cst_12 = arith.constant dense<0.000000e+00> : vector<8x4xf32>
    %12 = tpu.matmul %11, %0, %cst_12 {dimension_numbers = #tpu.dot_dimension_numbers<[1], [0], [0], [1], [0, 0, 1, 1], [], []>} : vector<8x128xf32>, vector<128x4xf32>, vector<8x4xf32> -> vector<8x4xf32>
    %13 = arith.mulf %10, %10 : vector<8x4xf32>
    %14 = arith.subf %12, %13 : vector<8x4xf32>
    %cst_13 = arith.constant 0.000000e+00 : f32
    %15 = vector.broadcast %cst_13 : f32 to vector<8x4xf32>
    %16 = arith.maximumf %14, %15 : vector<8x4xf32>
    %cst_14 = arith.constant 9.99999974E-6 : f32
    %17 = vector.broadcast %cst_14 : f32 to vector<8x4xf32>
    %18 = arith.addf %16, %17 : vector<8x4xf32>
    %19 = math.rsqrt %18 : vector<8x4xf32>
    %cst_15 = arith.constant dense<0.000000e+00> : vector<8x128xf32>
    %20 = tpu.matmul %19, %8, %cst_15 {dimension_numbers = #tpu.dot_dimension_numbers<[1], [0], [0], [1], [0, 0, 1, 1], [], []>} : vector<8x4xf32>, vector<4x128xf32>, vector<8x128xf32> -> vector<8x128xf32>
    %cst_16 = arith.constant 0.000000e+00 : f32
    %21 = vector.broadcast %cst_16 : f32 to vector<8x4xf32>
    %22 = arith.subf %21, %10 : vector<8x4xf32>
    %23 = arith.mulf %22, %19 : vector<8x4xf32>
    %cst_17 = arith.constant dense<0.000000e+00> : vector<8x128xf32>
    %24 = tpu.matmul %23, %8, %cst_17 {dimension_numbers = #tpu.dot_dimension_numbers<[1], [0], [0], [1], [0, 0, 1, 1], [], []>} : vector<8x4xf32>, vector<4x128xf32>, vector<8x128xf32> -> vector<8x128xf32>
    %25 = arith.mulf %7, %20 : vector<8x128xf32>
    %26 = vector.broadcast %9 : vector<1x128xf32> to vector<8x128xf32>
    %27 = arith.addf %24, %26 : vector<8x128xf32>
    %28 = arith.addf %25, %27 : vector<8x128xf32>
    %c0_18 = arith.constant 0 : index
    %c0_19 = arith.constant 0 : index
    %29 = memref.load %arg8[%c0_18, %c0_19] : memref<1x1xf32, #tpu.memory_space<smem>>
    %cst_20 = arith.constant 0.000000e+00 : f32
    %30 = vector.broadcast %cst_20 : f32 to vector<8x128xf32>
    %31 = arith.cmpf ogt, %28, %30 : vector<8x128xf32>
    %32 = vector.broadcast %29 : f32 to vector<8x128xf32>
    %33 = arith.mulf %32, %28 : vector<8x128xf32>
    %34 = arith.select %31, %28, %33 : vector<8x128xi1>, vector<8x128xf32>
    %35 = arith.truncf %34 : vector<8x128xf32> to vector<8x128xbf16>
    %c0_21 = arith.constant 0 : index
    %c0_22 = arith.constant 0 : index
    %36 = vector.load %arg9[%c0_21, %c0_22] : memref<128x128xbf16, #tpu.memory_space<vmem>>, vector<128x128xbf16>
    %cst_23 = arith.constant dense<0.000000e+00> : vector<8x128xf32>
    %37 = tpu.matmul %35, %36, %cst_23 {dimension_numbers = #tpu.dot_dimension_numbers<[1], [0], [0], [1], [0, 0, 1, 1], [], []>} : vector<8x128xbf16>, vector<128x128xbf16>, vector<8x128xf32> -> vector<8x128xf32>
    %c0_24 = arith.constant 0 : index
    %c0_25 = arith.constant 0 : index
    %38 = vector.load %arg10[%c0_24, %c0_25] : memref<1x128xf32, #tpu.memory_space<vmem>>, vector<1x128xf32>
    %39 = vector.broadcast %38 : vector<1x128xf32> to vector<8x128xf32>
    %40 = arith.addf %37, %39 : vector<8x128xf32>
    %c0_26 = arith.constant 0 : index
    %c0_27 = arith.constant 0 : index
    %41 = vector.load %arg4[%c0_26, %c0_27] : memref<4x128xf32, #tpu.memory_space<vmem>>, vector<4x128xf32>
    %c0_28 = arith.constant 0 : index
    %c0_29 = arith.constant 0 : index
    %42 = vector.load %arg11[%c0_28, %c0_29] : memref<1x128xf32, #tpu.memory_space<vmem>>, vector<1x128xf32>
    %cst_30 = arith.constant dense<0.000000e+00> : vector<8x4xf32>
    %43 = tpu.matmul %40, %0, %cst_30 {dimension_numbers = #tpu.dot_dimension_numbers<[1], [0], [0], [1], [0, 0, 1, 1], [], []>} : vector<8x128xf32>, vector<128x4xf32>, vector<8x4xf32> -> vector<8x4xf32>
    %44 = arith.mulf %40, %40 : vector<8x128xf32>
    %cst_31 = arith.constant dense<0.000000e+00> : vector<8x4xf32>
    %45 = tpu.matmul %44, %0, %cst_31 {dimension_numbers = #tpu.dot_dimension_numbers<[1], [0], [0], [1], [0, 0, 1, 1], [], []>} : vector<8x128xf32>, vector<128x4xf32>, vector<8x4xf32> -> vector<8x4xf32>
    %46 = arith.mulf %43, %43 : vector<8x4xf32>
    %47 = arith.subf %45, %46 : vector<8x4xf32>
    %cst_32 = arith.constant 0.000000e+00 : f32
    %48 = vector.broadcast %cst_32 : f32 to vector<8x4xf32>
    %49 = arith.maximumf %47, %48 : vector<8x4xf32>
    %cst_33 = arith.constant 9.99999974E-6 : f32
    %50 = vector.broadcast %cst_33 : f32 to vector<8x4xf32>
    %51 = arith.addf %49, %50 : vector<8x4xf32>
    %52 = math.rsqrt %51 : vector<8x4xf32>
    %cst_34 = arith.constant dense<0.000000e+00> : vector<8x128xf32>
    %53 = tpu.matmul %52, %41, %cst_34 {dimension_numbers = #tpu.dot_dimension_numbers<[1], [0], [0], [1], [0, 0, 1, 1], [], []>} : vector<8x4xf32>, vector<4x128xf32>, vector<8x128xf32> -> vector<8x128xf32>
    %cst_35 = arith.constant 0.000000e+00 : f32
    %54 = vector.broadcast %cst_35 : f32 to vector<8x4xf32>
    %55 = arith.subf %54, %43 : vector<8x4xf32>
    %56 = arith.mulf %55, %52 : vector<8x4xf32>
    %cst_36 = arith.constant dense<0.000000e+00> : vector<8x128xf32>
    %57 = tpu.matmul %56, %41, %cst_36 {dimension_numbers = #tpu.dot_dimension_numbers<[1], [0], [0], [1], [0, 0, 1, 1], [], []>} : vector<8x4xf32>, vector<4x128xf32>, vector<8x128xf32> -> vector<8x128xf32>
    %58 = arith.mulf %40, %53 : vector<8x128xf32>
    %59 = vector.broadcast %42 : vector<1x128xf32> to vector<8x128xf32>
    %60 = arith.addf %57, %59 : vector<8x128xf32>
    %61 = arith.addf %58, %60 : vector<8x128xf32>
    %c0_37 = arith.constant 0 : index
    %c0_38 = arith.constant 0 : index
    %62 = memref.load %arg12[%c0_37, %c0_38] : memref<1x1xf32, #tpu.memory_space<smem>>
    %cst_39 = arith.constant 0.000000e+00 : f32
    %63 = vector.broadcast %cst_39 : f32 to vector<8x128xf32>
    %64 = arith.cmpf ogt, %61, %63 : vector<8x128xf32>
    %65 = vector.broadcast %62 : f32 to vector<8x128xf32>
    %66 = arith.mulf %65, %61 : vector<8x128xf32>
    %67 = arith.select %64, %61, %66 : vector<8x128xi1>, vector<8x128xf32>
    %68 = arith.truncf %67 : vector<8x128xf32> to vector<8x128xbf16>
    %c0_40 = arith.constant 0 : index
    %c0_41 = arith.constant 0 : index
    %69 = vector.load %arg13[%c0_40, %c0_41] : memref<128x128xbf16, #tpu.memory_space<vmem>>, vector<128x128xbf16>
    %cst_42 = arith.constant dense<0.000000e+00> : vector<8x128xf32>
    %70 = tpu.matmul %68, %69, %cst_42 {dimension_numbers = #tpu.dot_dimension_numbers<[1], [0], [0], [1], [0, 0, 1, 1], [], []>} : vector<8x128xbf16>, vector<128x128xbf16>, vector<8x128xf32> -> vector<8x128xf32>
    %c0_43 = arith.constant 0 : index
    %c0_44 = arith.constant 0 : index
    %71 = vector.load %arg14[%c0_43, %c0_44] : memref<1x128xf32, #tpu.memory_space<vmem>>, vector<1x128xf32>
    %72 = vector.broadcast %71 : vector<1x128xf32> to vector<8x128xf32>
    %73 = arith.addf %70, %72 : vector<8x128xf32>
    %c0_45 = arith.constant 0 : index
    %c0_46 = arith.constant 0 : index
    %74 = vector.load %arg15[%c0_45, %c0_46] : memref<8x128xf32, #tpu.memory_space<vmem>>, vector<8x128xf32>
    tpu.vector_store %arg15[%c0_45, %c0_46], %73 {strides = array<i32>} : memref<8x128xf32, #tpu.memory_space<vmem>>, vector<8x128xf32>,
    return
  }
  func.func @transform_0(%arg0: i32) -> (i32, i32) {
    %c0_i32 = arith.constant 0 : i32
    %c0_i32_0 = arith.constant 0 : i32
    return %arg0, %c0_i32 : i32, i32
  }
  func.func @transform_1(%arg0: i32) -> (i32, i32) {
    %c0_i32 = arith.constant 0 : i32
    %c0_i32_0 = arith.constant 0 : i32
    %c0_i32_1 = arith.constant 0 : i32
    return %c0_i32, %c0_i32_0 : i32, i32
  }
  func.func @transform_2(%arg0: i32) -> (i32, i32) {
    %c0_i32 = arith.constant 0 : i32
    %c0_i32_0 = arith.constant 0 : i32
    %c0_i32_1 = arith.constant 0 : i32
    return %c0_i32, %c0_i32_0 : i32, i32
  }
  func.func @transform_3(%arg0: i32) -> (i32, i32) {
    %c0_i32 = arith.constant 0 : i32
    %c0_i32_0 = arith.constant 0 : i32
    %c0_i32_1 = arith.constant 0 : i32
    return %c0_i32, %c0_i32_0 : i32, i32
  }
  func.func @transform_4(%arg0: i32) -> (i32, i32) {
    %c0_i32 = arith.constant 0 : i32
    %c0_i32_0 = arith.constant 0 : i32
    %c0_i32_1 = arith.constant 0 : i32
    return %c0_i32, %c0_i32_0 : i32, i32
  }
  func.func @transform_5(%arg0: i32) -> (i32, i32) {
    %c0_i32 = arith.constant 0 : i32
    %c0_i32_0 = arith.constant 0 : i32
    %c0_i32_1 = arith.constant 0 : i32
    return %c0_i32, %c0_i32_0 : i32, i32
  }
  func.func @transform_6(%arg0: i32) -> (i32, i32) {
    %c0_i32 = arith.constant 0 : i32
    %c0_i32_0 = arith.constant 0 : i32
    %c0_i32_1 = arith.constant 0 : i32
    return %c0_i32, %c0_i32_0 : i32, i32
  }
  func.func @transform_7(%arg0: i32) -> (i32, i32) {
    %c0_i32 = arith.constant 0 : i32
    %c0_i32_0 = arith.constant 0 : i32
    %c0_i32_1 = arith.constant 0 : i32
    return %c0_i32, %c0_i32_0 : i32, i32
  }
  func.func @transform_8(%arg0: i32) -> (i32, i32) {
    %c0_i32 = arith.constant 0 : i32
    %c0_i32_0 = arith.constant 0 : i32
    %c0_i32_1 = arith.constant 0 : i32
    return %c0_i32, %c0_i32_0 : i32, i32
  }
  func.func @transform_9(%arg0: i32) -> (i32, i32) {
    %c0_i32 = arith.constant 0 : i32
    %c0_i32_0 = arith.constant 0 : i32
    %c0_i32_1 = arith.constant 0 : i32
    return %c0_i32, %c0_i32_0 : i32, i32
  }
  func.func @transform_10(%arg0: i32) -> (i32, i32) {
    %c0_i32 = arith.constant 0 : i32
    %c0_i32_0 = arith.constant 0 : i32
    %c0_i32_1 = arith.constant 0 : i32
    return %c0_i32, %c0_i32_0 : i32, i32
  }
  func.func @transform_11(%arg0: i32) -> (i32, i32) {
    %c0_i32 = arith.constant 0 : i32
    %c0_i32_0 = arith.constant 0 : i32
    %c0_i32_1 = arith.constant 0 : i32
    return %c0_i32, %c0_i32_0 : i32, i32
  }
  func.func @transform_12(%arg0: i32) -> (i32, i32) {
    %c0_i32 = arith.constant 0 : i32
    %c0_i32_0 = arith.constant 0 : i32
    %c0_i32_1 = arith.constant 0 : i32
    return %c0_i32, %c0_i32_0 : i32, i32
  }
  func.func @transform_13(%arg0: i32) -> (i32, i32) {
    %c0_i32 = arith.constant 0 : i32
    %c0_i32_0 = arith.constant 0 : i32
    %c0_i32_1 = arith.constant 0 : i32
    return %c0_i32, %c0_i32_0 : i32, i32
  }
  func.func @transform_14(%arg0: i32) -> (i32, i32) {
    %c0_i32 = arith.constant 0 : i32
    %c0_i32_0 = arith.constant 0 : i32
    return %arg0, %c0_i32 : i32, i32
  }
}

</mosaic_0001>

<bundles_post_ra>
// kernel: tpu_custom_call.1
= control target key start
LH: loop header
LB: loop body
LE: loop exit
PB: predicated region body
PF: predicated region fallthrough
CT: control target
= control target key end

     0   :  { %21 = vsyncpa [#allocation5], 0  ;;  %s1893_s0 = inlined_call_operand.vmem [shape: f32[8,32], index: 0, kind: input, shape index: {}]   ;;  %s1894_s1 = inlined_call_operand.vmem [shape: f32[128,4], index: 1, kind: input, shape index: {}]   ;;  %s1895_s2 = inlined_call_operand.hbm [shape: f32[4,128], index: 2, kind: input, shape index: {}]   ;;  %s1896_s3 = inlined_call_operand.vmem [shape: f32[4,128], index: 3, kind: input, shape index: {}]   ;;  %s1897_s4 = inlined_call_operand.hbm [shape: bf16[32,128], index: 4, kind: input, shape index: {}]   ;;  %s1898_s5 = inlined_call_operand.vmem [shape: f32[1,128], index: 5, kind: input, shape index: {}]   ;;  %s1899_s6 = inlined_call_operand.vmem [shape: f32[1,128], index: 6, kind: input, shape index: {}]   ;;  %s1900_s7 = inlined_call_operand.<no memory space> [shape: f32[1,1], index: 7, kind: input, shape index: {}]   ;;  %s1901_s8 = inlined_call_operand.vmem [shape: bf16[128,128], index: 8, kind: input, shape index: {}]   ;;  %s1902_s9 = inlined_call_operand.vmem [shape: f32[1,128], index: 9, kind: input, shape index: {}]   ;;  %s1903_s10 = inlined_call_operand.vmem [shape: f32[1,128], index: 10, kind: input, shape index: {}]   ;;  %s1904_s11 = inlined_call_operand.<no memory space> [shape: f32[1,1], index: 11, kind: input, shape index: {}]   ;;  %s1905_s12 = inlined_call_operand.vmem [shape: bf16[128,128], index: 12, kind: input, shape index: {}]   ;;  %s1906_s13 = inlined_call_operand.vmem [shape: f32[1,128], index: 13, kind: input, shape index: {}]   ;;  %s1907_s14 = inlined_call_operand.hbm [shape: f32[8,128], index: 14, kind: output, shape index: {}]  }
   0x1   :  { %22 = vsyncpa [#allocation8], 0 }
   0x2   :  { %23 = vsyncpa [#allocation6], 0  ;;  %s1461_s29 = smov [#allocation4]   ;;  %s1462_s15 = smov [#allocation7]  }
   0x3   :  { %s34_s30 = sshll.u32 %s1461_s29, 4  ;;  %s45_s16 = sshll.u32 %s1462_s15, 4  ;;  %s35_s30 = int_to_ptr.vmem [resolvable:$true] %s34_s30  ;;  %s46_s16 = int_to_ptr.vmem [resolvable:$true] %s45_s16 }
   0x4   :  { %s1403_s17 = scalar_lea.vmem %s35_s30, 64  ;;  %p1408_p1 = scmp.lt.s32.totalorder %s35_s30, %s35_s30 }
   0x5   :  { %p1404_p0 = scmp.ne.s32.totalorder %s35_s30, %s1403_s17  ;;  %p1409_p2 = scmp.lt.s32.totalorder %s1403_s17, %s1403_s17 }
   0x7   :  { %p1410_p3 = por %p1409_p2, %p1408_p1 }
   0x9   :  { %p1411_p4 = pnand %p1410_p3, %p1404_p0 }
   0xb   :  { %1414 = shalt.err (!%p1411_p4)
}
   0xc   :  { %37 = dma.hbm_to_vmem [thread:$0]  %s1895_s2, 64, %s35_s30, [#allocation5]  }
   0xd   :  { %s1423_s20 = scalar_lea.vmem %s46_s16, 256  ;;  %p1428_p6 = scmp.lt.s32.totalorder %s46_s16, %s46_s16 }
   0xe   :  { %p1424_p5 = scmp.ne.s32.totalorder %s46_s16, %s1423_s20  ;;  %p1429_p7 = scmp.lt.s32.totalorder %s1423_s20, %s1423_s20 }
  0x10   :  { %p1430_p8 = por %p1429_p7, %p1428_p6 }
  0x12   :  { %p1431_p9 = pnand %p1430_p8, %p1424_p5 }
  0x14   :  { %1434 = shalt.err (!%p1431_p9)
}
  0x15   :  { %s1463_s21 = smov 64   ;;  %s1464_s22 = smov 4  }
  0x16   :  { %51 = dma.hbm_to_vmem [thread:$0]  %s1897_s4, 256, %s46_s16, [#allocation8], %s1463_s21, %s1463_s21, %s1464_s22  }
  0x17   :  { %1455 = dma.done.wait [#allocation5], 64  }
  0x18   :  { %1456 = vsyncadd [#allocation5], 4294967232 }
  0x19   :  { %1457 = dma.done.wait [#allocation8], 256  }
  0x1a   :  { %1458 = vsyncadd [#allocation8], 4294967040  ;;  %v1465_v0 = vmov 0.0   ;;  %vm1466_vm0 = vmmov 0   ;;  %v1373_v1 = vld [vmem:[#allocation7 + $0x8] sm:$0xff]   ;;  %v1374_v2 = vld [vmem:[#allocation7] sm:$0xff]   ;;  %v473_v54 = vstv %s1900_s7 }
  0x1b   :  { %1158 = vmatprep.subr.bf16.mxu0 %v1465_v0  ;;  %1162 = vmatprep.mubr.msk.bf16.mxu0 %vm1466_vm0, %v1465_v0  ;;  %v93_v3 = vld [vmem:[%s1893_s0] sm:$0xff]  ;;  %v1561_v4 = vld [vmem:[%s1894_s1 + $0x78] sm:$0xff]  ;;  %v1566_v5 = vld [vmem:[%s1894_s1 + $0x70] sm:$0xff]  ;;  %vm118_vm1 = vcmask 261120   ;;  %vm314_vm2 = vcmask 1043456   ;;  %vm310_vm3 = vcmask 31744  }
  0x1c   :  { %1166 = vmatprep.subr.mxu1 %v1465_v0  ;;  %1198 = vmatprep.mubr.msk.f32.mxu1 %vm1466_vm0, %v1465_v0  ;;  %v1574_v6 = vld [vmem:[%s1894_s1 + $0x68] sm:$0xff]  ;;  %v94_v7 = vpack.c.bf16 %v93_v3, %v93_v3  ;;  %v1581_v8 = vld [vmem:[%s1894_s1 + $0x60] sm:$0xff]  ;;  %v1588_v9 = vld [vmem:[%s1894_s1 + $0x58] sm:$0xff]  ;;  %s1467_s21 = smov [#allocation9]  }
  0x1d   :  { %1159 = vmatpush3.bf16.msra.mxu0 %v1373_v1  ;;  %1167 = vmatpush3.msra.mxu1 %v1561_v4  ;;  %v1594_v10 = vld [vmem:[%s1894_s1 + $0x50] sm:$0xff]  ;;  %v1602_v11 = vld [vmem:[%s1894_s1 + $0x48] sm:$0xff]  ;;  %v1611_v12 = vld [vmem:[%s1894_s1 + $0x40] sm:$0xff] }
  0x1e   :  { %1160 = vmatprep.subr.bf16.mxu0 %v1465_v0  ;;  %1168 = vmatprep.subr.mxu1 %v1465_v0  ;;  %v1620_v13 = vld [vmem:[%s1894_s1 + $0x38] sm:$0xff]  ;;  %v1633_v14 = vld [vmem:[%s1894_s1 + $0x30] sm:$0xff]  ;;  %v1642_v15 = vld [vmem:[%s1894_s1 + $0x28] sm:$0xff] }
  0x1f   :  { %1169 = vmatpush3.msra.mxu1 %v1566_v5  ;;  %v1651_v16 = vld [vmem:[%s1894_s1 + $0x20] sm:$0xff]  ;;  %v1660_v17 = vld [vmem:[%s1894_s1 + $0x18] sm:$0xff]  ;;  %v1669_v18 = vld [vmem:[%s1894_s1 + $0x10] sm:$0xff] }
  0x20   :  { %1170 = vmatprep.subr.mxu1 %v1465_v0  ;;  %v1691_v19 = vld [vmem:[%s1894_s1 + $0x8] sm:$0xff]  ;;  %v1699_v20 = vld [vmem:[%s1894_s1] sm:$0xff]  ;;  %v1375_v37 = vld [vmem:[%s1901_s8 + $0x38] sm:$0xff]  }
  0x21   :  { %1161 = vmatpush3.bf16.msra.mxu0 %v1374_v2  ;;  %1171 = vmatpush3.msra.mxu1 %v1574_v6  ;;  %v1029_v21 = vld [vmem:[%s1898_s5] ss:$0 sm:$0xff]  ;;  %v1376_v41 = vld [vmem:[%s1901_s8 + $0x30] sm:$0xff]   ;;  %v1377_v42 = vld [vmem:[%s1901_s8 + $0x28] sm:$0xff]  }
  0x22   :  { %1201 = vmatprep.subr.mxu0 %v1465_v0  ;;  %1172 = vmatprep.subr.mxu1 %v1465_v0  ;;  %v162_v28 = vld [vmem:[#allocation4] sm:$0xf]  ;;  %v1379_v44 = vld [vmem:[%s1901_s8 + $0x18] sm:$0xff]   ;;  %v1380_v45 = vld [vmem:[%s1901_s8 + $0x10] sm:$0xff]  }
  0x23   :  { %1173 = vmatpush3.msra.mxu1 %v1581_v8  ;;  %v1378_v43 = vld [vmem:[%s1901_s8 + $0x20] sm:$0xff]   ;;  %v1381_v46 = vld [vmem:[%s1901_s8 + $0x8] sm:$0xff]  }
  0x24   :  { %1163 = vmatmul.mubr.msk.bf16.vlgmr.msra.gmra.mxu0 %vm118_vm1, %v94_v7  ;;  %1174 = vmatprep.subr.mxu1 %v1465_v0  ;;  %v1382_v47 = vld [vmem:[%s1901_s8] sm:$0xff]  }
  0x25   :  { %1202 = vmatpush3.msra.mxu0 %v1561_v4  ;;  %1175 = vmatpush3.msra.mxu1 %v1588_v9  ;;  %v1035_v49 = vld [vmem:[%s1899_s6] ss:$0 sm:$0xff] }
  0x26   :  { %1203 = vmatprep.subr.mxu0 %v1465_v0  ;;  %1176 = vmatprep.subr.mxu1 %v1465_v0  ;;  %v1038_v60 = vld [vmem:[%s1902_s9] ss:$0 sm:$0xff] }
  0x27   :  { %1204 = vmatpush3.msra.mxu0 %v1566_v5  ;;  %1177 = vmatpush3.msra.mxu1 %v1594_v10 }
  0x28   :  { %1205 = vmatprep.subr.mxu0 %v1465_v0  ;;  %1178 = vmatprep.subr.mxu1 %v1465_v0 }
  0x29   :  { %1206 = vmatpush3.msra.mxu0 %v1574_v6  ;;  %1179 = vmatpush3.msra.mxu1 %v1602_v11 }
  0x2a   :  { %1207 = vmatprep.subr.mxu0 %v1465_v0  ;;  %1180 = vmatprep.subr.mxu1 %v1465_v0 }
  0x2b   :  { %1208 = vmatpush3.msra.mxu0 %v1581_v8  ;;  %1181 = vmatpush3.msra.mxu1 %v1611_v12 }
  0x2c   :  { %1209 = vmatprep.subr.mxu0 %v1465_v0  ;;  %1182 = vmatprep.subr.mxu1 %v1465_v0 }
  0x2d   :  { %1210 = vmatpush3.msra.mxu0 %v1588_v9  ;;  %1183 = vmatpush3.msra.mxu1 %v1620_v13 }
  0x2e   :  { %1211 = vmatprep.subr.mxu0 %v1465_v0  ;;  %1184 = vmatprep.subr.mxu1 %v1465_v0 }
  0x2f   :  { %1212 = vmatpush3.msra.mxu0 %v1594_v10  ;;  %1185 = vmatpush3.msra.mxu1 %v1633_v14 }
  0x30   :  { %1213 = vmatprep.subr.mxu0 %v1465_v0  ;;  %1186 = vmatprep.subr.mxu1 %v1465_v0 }
  0x31   :  { %1214 = vmatpush3.msra.mxu0 %v1602_v11  ;;  %1187 = vmatpush3.msra.mxu1 %v1642_v15 }
  0x32   :  { %1215 = vmatprep.subr.mxu0 %v1465_v0  ;;  %1188 = vmatprep.subr.mxu1 %v1465_v0 }
  0x33   :  { %1216 = vmatpush3.msra.mxu0 %v1611_v12  ;;  %1189 = vmatpush3.msra.mxu1 %v1651_v16 }
  0x34   :  { %1217 = vmatprep.subr.mxu0 %v1465_v0  ;;  %1190 = vmatprep.subr.mxu1 %v1465_v0 }
  0x35   :  { %1218 = vmatpush3.msra.mxu0 %v1620_v13  ;;  %1191 = vmatpush3.msra.mxu1 %v1660_v17 }
  0x36   :  { %1219 = vmatprep.subr.mxu0 %v1465_v0  ;;  %1192 = vmatprep.subr.mxu1 %v1465_v0 }
  0x37   :  { %1220 = vmatpush3.msra.mxu0 %v1633_v14  ;;  %1193 = vmatpush3.msra.mxu1 %v1669_v18 }
  0x38   :  { %1221 = vmatprep.subr.mxu0 %v1465_v0  ;;  %1194 = vmatprep.subr.mxu1 %v1465_v0 }
  0x39   :  { %1222 = vmatpush3.msra.mxu0 %v1642_v15  ;;  %1233 = vmatprep.mubr.msk.f32.mxu0 %vm1466_vm0, %v1465_v0 }
  0x3a   :  { %1223 = vmatprep.subr.mxu0 %v1465_v0  ;;  %1195 = vmatpush3.msra.mxu1 %v1691_v19 }
  0x3b   :  { %1224 = vmatpush3.msra.mxu0 %v1651_v16  ;;  %1196 = vmatprep.subr.mxu1 %v1465_v0 }
  0x3c   :  { %1225 = vmatprep.subr.mxu0 %v1465_v0  ;;  %1197 = vmatpush3.msra.mxu1 %v1699_v20 }
  0x3d   :  { %1226 = vmatpush3.msra.mxu0 %v1660_v17  ;;  %1241 = vmatprep.subr.mxu1 %v1465_v0 }
  0x3e   :  { %1227 = vmatprep.subr.mxu0 %v1465_v0 }
  0x3f   :  { %1228 = vmatpush3.msra.mxu0 %v1669_v18 }
  0x40   :  { %1229 = vmatprep.subr.mxu0 %v1465_v0 }
  0x41   :  { %1230 = vmatpush3.msra.mxu0 %v1691_v19 }
  0x42   :  { %1231 = vmatprep.subr.mxu0 %v1465_v0 }
  0x43   :  { %1232 = vmatpush3.msra.mxu0 %v1699_v20 }
  0x44   :  { %1236 = vmatprep.subr.mxu0 %v1465_v0 }
  0xe4   :  { %v156_v22 = vpop.f32.mrf.mxu0 }
  0xe5   :  { %v1709_v23 = vadd.f32 %v1029_v21, %v156_v22  ;;  %v1388_v21 = vld [vmem:[%s1905_s12 + $0x10] sm:$0xff]   ;;  %v1389_v22 = vld [vmem:[%s1905_s12 + $0x8] sm:$0xff]  }
  0xe6   :  { %v1164_v24 = vpop.f32.mrf.mxu0 }
  0xe7   :  { %v234_v25 = vmul.f32 %v1709_v23, %v1709_v23  ;;  %1199 = vmatmul.mubr.f32.vlgmr.msra.gmra.mxu1 %v1709_v23 }
  0xe8   :  { %v159_v26 = vpop.f32.mrf.mxu0  ;;  %1243 = vmatprep.mubr.msk.f32.mxu1 %vm1466_vm0, %v1465_v0  ;;  %1242 = vmatpush3.msk.msra.mxu1 %vm314_vm2, %v162_v28 }
  0xe9   :  { %1234 = vmatmul.mubr.f32.vlgmr.msra.gmra.mxu0 %v234_v25  ;;  %1266 = vmatprep.subr.mxu1 %v1465_v0  ;;  %v1049_v26 = vld [vmem:[%s1903_s10] ss:$0 sm:$0xff]  ;;  %s1019_s10 = sshll.u32 %s1467_s21, 4  ;;  %s1020_s10 = int_to_ptr.vmem [resolvable:$true] %s1019_s10 }
  0xea   :  { %v1165_v27 = vpop.f32.mrf.mxu0  ;;  %1238 = vmatprep.mubr.msk.f32.mxu0 %vm1466_vm0, %v1465_v0  ;;  %1237 = vmatpush3.msk.msra.mxu0 %vm314_vm2, %v162_v28  ;;  %p1440_p11 = scmp.lt.s32.totalorder %s1020_s10, %s1020_s10 }
  0xeb   :  { %1246 = vmatprep.subr.bf16.mxu0 %v1465_v0 }
 0x1a7   :  { %v230_v29 = vpop.f32.mrf.mxu1 }
 0x1a8   :  { %v305_v30 = vmul.f32 %v230_v29, %v230_v29  ;;  %v388_v38 = vsub.f32 0.0, %v230_v29 }
 0x1a9   :  { %v1200_v31 = vpop.f32.mrf.mxu1  ;;  %v301_v32 = vpop.f32.mrf.mxu0 }
 0x1aa   :  { %v306_v33 = vsub.f32 %v301_v32, %v305_v30  ;;  %v897_v30 = vstv %s1904_s11  ;;  %s1435_s11 = scalar_lea.vmem %s1020_s10, 128 }
 0x1ab   :  { %v1235_v34 = vpop.f32.mrf.mxu0  ;;  %p1436_p10 = scmp.ne.s32.totalorder %s1020_s10, %s1435_s11  ;;  %p1441_p12 = scmp.lt.s32.totalorder %s1435_s11, %s1435_s11 }
 0x1ac   :  { %v307_v35 = vmax.f32 %v306_v33, 0.0 }
 0x1ad   :  { %p1442_p13 = por %p1441_p12, %p1440_p11 }
 0x1ae   :  { %v308_v36 = vadd.f32 1e-05, %v307_v35  ;;  %v1052_v35 = vld [vmem:[%s1906_s13] ss:$0 sm:$0xff] }
 0x1af   :  { %p1443_p0 = pnand %p1442_p13, %p1436_p10 }
 0x1b0   :  { %1391 = vrsqrt.f32 %v308_v36 }
 0x1bd   :  { %v1392_v39 = vpop.eup %1391 }
 0x1be   :  { %1239 = vmatmul.mubr.msk.f32.vlgmr.msra.gmra.mxu0 %vm310_vm3, %v1392_v39  ;;  %v389_v40 = vmul.f32 %v1392_v39, %v388_v38 }
 0x1bf   :  { %1247 = vmatpush3.bf16.msra.mxu0 %v1375_v37  ;;  %1262 = vmatprep.mubr.msk.bf16.mxu0 %vm1466_vm0, %v1465_v0 }
 0x1c0   :  { %1244 = vmatmul.mubr.msk.f32.vlgmr.msra.gmra.mxu1 %vm310_vm3, %v389_v40  ;;  %1248 = vmatprep.subr.bf16.mxu0 %v1465_v0 }
 0x1c1   :  { %1267 = vmatpush3.msra.mxu1 %v1561_v4  ;;  %1298 = vmatprep.mubr.msk.f32.mxu1 %vm1466_vm0, %v1465_v0 }
 0x1c2   :  { %1268 = vmatprep.subr.mxu1 %v1465_v0 }
 0x1c3   :  { %1249 = vmatpush3.bf16.msra.mxu0 %v1376_v41  ;;  %1269 = vmatpush3.msra.mxu1 %v1566_v5 }
 0x1c4   :  { %1250 = vmatprep.subr.bf16.mxu0 %v1465_v0  ;;  %1270 = vmatprep.subr.mxu1 %v1465_v0 }
 0x1c5   :  { %1271 = vmatpush3.msra.mxu1 %v1574_v6 }
 0x1c6   :  { %1272 = vmatprep.subr.mxu1 %v1465_v0 }
 0x1c7   :  { %1251 = vmatpush3.bf16.msra.mxu0 %v1377_v42  ;;  %1273 = vmatpush3.msra.mxu1 %v1581_v8 }
 0x1c8   :  { %1252 = vmatprep.subr.bf16.mxu0 %v1465_v0  ;;  %1274 = vmatprep.subr.mxu1 %v1465_v0 }
 0x1c9   :  { %1275 = vmatpush3.msra.mxu1 %v1588_v9 }
 0x1ca   :  { %1276 = vmatprep.subr.mxu1 %v1465_v0 }
 0x1cb   :  { %1253 = vmatpush3.bf16.msra.mxu0 %v1378_v43  ;;  %1277 = vmatpush3.msra.mxu1 %v1594_v10 }
 0x1cc   :  { %1254 = vmatprep.subr.bf16.mxu0 %v1465_v0  ;;  %1278 = vmatprep.subr.mxu1 %v1465_v0 }
 0x1cd   :  { %1279 = vmatpush3.msra.mxu1 %v1602_v11 }
 0x1ce   :  { %1280 = vmatprep.subr.mxu1 %v1465_v0 }
 0x1cf   :  { %1255 = vmatpush3.bf16.msra.mxu0 %v1379_v44  ;;  %1281 = vmatpush3.msra.mxu1 %v1611_v12 }
 0x1d0   :  { %1256 = vmatprep.subr.bf16.mxu0 %v1465_v0  ;;  %1282 = vmatprep.subr.mxu1 %v1465_v0 }
 0x1d1   :  { %1283 = vmatpush3.msra.mxu1 %v1620_v13 }
 0x1d2   :  { %1284 = vmatprep.subr.mxu1 %v1465_v0 }
 0x1d3   :  { %1285 = vmatpush3.msra.mxu1 %v1633_v14  ;;  %1257 = vmatpush3.bf16.msra.mxu0 %v1380_v45 }
 0x1d4   :  { %1286 = vmatprep.subr.mxu1 %v1465_v0  ;;  %1258 = vmatprep.subr.bf16.mxu0 %v1465_v0 }
 0x1d5   :  { %1287 = vmatpush3.msra.mxu1 %v1642_v15 }
 0x1d6   :  { %1288 = vmatprep.subr.mxu1 %v1465_v0 }
 0x1d7   :  { %1289 = vmatpush3.msra.mxu1 %v1651_v16  ;;  %1259 = vmatpush3.bf16.msra.mxu0 %v1381_v46 }
 0x1d8   :  { %1290 = vmatprep.subr.mxu1 %v1465_v0  ;;  %1260 = vmatprep.subr.bf16.mxu0 %v1465_v0 }
 0x1d9   :  { %1291 = vmatpush3.msra.mxu1 %v1660_v17 }
 0x1da   :  { %1292 = vmatprep.subr.mxu1 %v1465_v0 }
 0x1db   :  { %1293 = vmatpush3.msra.mxu1 %v1669_v18  ;;  %1261 = vmatpush3.bf16.msra.mxu0 %v1382_v47 }
 0x1dc   :  { %1294 = vmatprep.subr.mxu1 %v1465_v0  ;;  %1301 = vmatprep.subr.mxu0 %v1465_v0 }
 0x1dd   :  { %1295 = vmatpush3.msra.mxu1 %v1691_v19 }
 0x1de   :  { %1296 = vmatprep.subr.mxu1 %v1465_v0 }
 0x1df   :  { %1297 = vmatpush3.msra.mxu1 %v1699_v20 }
 0x1e0   :  { %1336 = vmatprep.subr.mxu1 %v1465_v0 }
 0x27e   :  { %v384_v48 = vpop.f32.mrf.mxu0 }
 0x27f   :  { %v390_v52 = vmul.f32 %v384_v48, %v1709_v23  ;;  %v1390_v23 = vld [vmem:[%s1905_s12] sm:$0xff]  }
 0x280   :  { %v1240_v50 = vpop.f32.mrf.mxu0  ;;  %v466_v51 = vpop.f32.mrf.mxu1 }
 0x281   :  { %v467_v53 = vadd.f32 %v1035_v49, %v466_v51 }
 0x282   :  { %v1245_v55 = vpop.f32.mrf.mxu1 }
 0x283   :  { %v470_v56 = vadd.f32 %v467_v53, %v390_v52 }
 0x285   :  { %vm472_vm4 = vcmp.gt.f32.partialorder %v470_v56, 0.0  ;;  %v474_v57 = vmul.f32 %v473_v54, %v470_v56 }
 0x287   :  { %v475_v58 = vsel %vm472_vm4, %v470_v56, %v474_v57 }
 0x288   :  { %v476_v59 = vpack.c.bf16 %v475_v58, %v475_v58 }
 0x28a   :  { %1263 = vmatmul.mubr.bf16.vlgmr.msra.gmra.mxu0 %v476_v59 }
 0x28b   :  { %1302 = vmatpush3.msra.mxu0 %v1561_v4  ;;  %1333 = vmatprep.mubr.msk.f32.mxu0 %vm1466_vm0, %v1465_v0  ;;  %v588_v4 = vld [vmem:[%s1896_s3] sm:$0xf] }
 0x28c   :  { %1303 = vmatprep.subr.mxu0 %v1465_v0 }
 0x28d   :  { %1304 = vmatpush3.msra.mxu0 %v1566_v5 }
 0x28e   :  { %1305 = vmatprep.subr.mxu0 %v1465_v0 }
 0x28f   :  { %1306 = vmatpush3.msra.mxu0 %v1574_v6 }
 0x290   :  { %1307 = vmatprep.subr.mxu0 %v1465_v0 }
 0x291   :  { %1308 = vmatpush3.msra.mxu0 %v1581_v8 }
 0x292   :  { %1309 = vmatprep.subr.mxu0 %v1465_v0 }
 0x293   :  { %1310 = vmatpush3.msra.mxu0 %v1588_v9 }
 0x294   :  { %1311 = vmatprep.subr.mxu0 %v1465_v0 }
 0x295   :  { %1312 = vmatpush3.msra.mxu0 %v1594_v10 }
 0x296   :  { %1313 = vmatprep.subr.mxu0 %v1465_v0 }
 0x297   :  { %1314 = vmatpush3.msra.mxu0 %v1602_v11 }
 0x298   :  { %1315 = vmatprep.subr.mxu0 %v1465_v0 }
 0x299   :  { %1316 = vmatpush3.msra.mxu0 %v1611_v12 }
 0x29a   :  { %1317 = vmatprep.subr.mxu0 %v1465_v0 }
 0x29b   :  { %1318 = vmatpush3.msra.mxu0 %v1620_v13 }
 0x29c   :  { %1319 = vmatprep.subr.mxu0 %v1465_v0 }
 0x29d   :  { %1320 = vmatpush3.msra.mxu0 %v1633_v14 }
 0x29e   :  { %1321 = vmatprep.subr.mxu0 %v1465_v0 }
 0x29f   :  { %1322 = vmatpush3.msra.mxu0 %v1642_v15  ;;  %v1383_v15 = vld [vmem:[%s1905_s12 + $0x38] sm:$0xff]  }
 0x2a0   :  { %1323 = vmatprep.subr.mxu0 %v1465_v0 }
 0x2a1   :  { %1324 = vmatpush3.msra.mxu0 %v1651_v16 }
 0x2a2   :  { %1325 = vmatprep.subr.mxu0 %v1465_v0 }
 0x2a3   :  { %1326 = vmatpush3.msra.mxu0 %v1660_v17  ;;  %v1384_v17 = vld [vmem:[%s1905_s12 + $0x30] sm:$0xff]  }
 0x2a4   :  { %1327 = vmatprep.subr.mxu0 %v1465_v0 }
 0x2a5   :  { %1328 = vmatpush3.msra.mxu0 %v1669_v18  ;;  %v1385_v18 = vld [vmem:[%s1905_s12 + $0x28] sm:$0xff]  }
 0x2a6   :  { %1329 = vmatprep.subr.mxu0 %v1465_v0 }
 0x2a7   :  { %1330 = vmatpush3.msra.mxu0 %v1691_v19  ;;  %v1386_v19 = vld [vmem:[%s1905_s12 + $0x20] sm:$0xff]  }
 0x2a8   :  { %1331 = vmatprep.subr.mxu0 %v1465_v0 }
 0x2a9   :  { %1332 = vmatpush3.msra.mxu0 %v1699_v20  ;;  %v1387_v20 = vld [vmem:[%s1905_s12 + $0x18] sm:$0xff]  }
 0x34a   :  { %v582_v61 = vpop.f32.mrf.mxu0 }
 0x34b   :  { %v583_v62 = vadd.f32 %v1038_v60, %v582_v61 }
 0x34c   :  { %v1264_v63 = vpop.f32.mrf.mxu0 }
 0x34d   :  { %v660_v1 = vmul.f32 %v583_v62, %v583_v62  ;;  %1299 = vmatmul.mubr.f32.vlgmr.msra.gmra.mxu1 %v583_v62 }
 0x34e   :  { %v585_v2 = vpop.f32.mrf.mxu0  ;;  %1338 = vmatprep.mubr.msk.f32.mxu1 %vm1466_vm0, %v1465_v0  ;;  %1337 = vmatpush3.msk.msra.mxu1 %vm314_vm2, %v588_v4 }
 0x34f   :  { %1334 = vmatmul.mubr.f32.vlgmr.msra.gmra.mxu0 %v660_v1  ;;  %1341 = vmatprep.subr.mxu1 %v1465_v0 }
 0x350   :  { %v1265_v3 = vpop.f32.mrf.mxu0 }
 0x40d   :  { %v656_v5 = vpop.f32.mrf.mxu1 }
 0x40e   :  { %v731_v6 = vmul.f32 %v656_v5, %v656_v5  ;;  %v812_v14 = vsub.f32 0.0, %v656_v5 }
 0x40f   :  { %v1300_v7 = vpop.f32.mrf.mxu1  ;;  %v727_v8 = vpop.f32.mrf.mxu0 }
 0x410   :  { %v732_v9 = vsub.f32 %v727_v8, %v731_v6 }
 0x411   :  { %v1335_v10 = vpop.f32.mrf.mxu0 }
 0x412   :  { %v733_v11 = vmax.f32 %v732_v9, 0.0 }
 0x414   :  { %v734_v12 = vadd.f32 1e-05, %v733_v11 }
 0x416   :  { %1393 = vrsqrt.f32 %v734_v12 }
 0x423   :  { %v1394_v13 = vpop.eup %1393 }
 0x424   :  { %1339 = vmatmul.mubr.msk.f32.vlgmr.msra.gmra.mxu1 %vm310_vm3, %v1394_v13  ;;  %v813_v16 = vmul.f32 %v1394_v13, %v812_v14 }
 0x425   :  { %1342 = vmatpush3.msk.msra.mxu1 %vm314_vm2, %v588_v4  ;;  %1343 = vmatprep.mubr.msk.f32.mxu1 %vm1466_vm0, %v1465_v0 }
 0x426   :  { %1346 = vmatprep.subr.bf16.mxu1 %v1465_v0 }
 0x428   :  { %1344 = vmatmul.mubr.msk.f32.vlgmr.msra.gmra.mxu1 %vm310_vm3, %v813_v16 }
 0x429   :  { %1347 = vmatpush3.bf16.msra.mxu1 %v1383_v15  ;;  %1362 = vmatprep.mubr.msk.bf16.mxu1 %vm1466_vm0, %v1465_v0 }
 0x42a   :  { %1348 = vmatprep.subr.bf16.mxu1 %v1465_v0 }
 0x42d   :  { %1349 = vmatpush3.bf16.msra.mxu1 %v1384_v17 }
 0x42e   :  { %1350 = vmatprep.subr.bf16.mxu1 %v1465_v0 }
 0x431   :  { %1351 = vmatpush3.bf16.msra.mxu1 %v1385_v18 }
 0x432   :  { %1352 = vmatprep.subr.bf16.mxu1 %v1465_v0 }
 0x435   :  { %1353 = vmatpush3.bf16.msra.mxu1 %v1386_v19 }
 0x436   :  { %1354 = vmatprep.subr.bf16.mxu1 %v1465_v0 }
 0x439   :  { %1355 = vmatpush3.bf16.msra.mxu1 %v1387_v20 }
 0x43a   :  { %1356 = vmatprep.subr.bf16.mxu1 %v1465_v0 }
 0x43d   :  { %1357 = vmatpush3.bf16.msra.mxu1 %v1388_v21 }
 0x43e   :  { %1358 = vmatprep.subr.bf16.mxu1 %v1465_v0 }
 0x441   :  { %1359 = vmatpush3.bf16.msra.mxu1 %v1389_v22 }
 0x442   :  { %1360 = vmatprep.subr.bf16.mxu1 %v1465_v0 }
 0x445   :  { %1361 = vmatpush3.bf16.msra.mxu1 %v1390_v23 }
 0x4e4   :  { %v808_v24 = vpop.f32.mrf.mxu1 }
 0x4e5   :  { %v814_v28 = vmul.f32 %v808_v24, %v583_v62 }
 0x4e6   :  { %v1340_v25 = vpop.f32.mrf.mxu1 }
 0x4e8   :  { %v890_v27 = vpop.f32.mrf.mxu1 }
 0x4e9   :  { %v891_v29 = vadd.f32 %v1049_v26, %v890_v27 }
 0x4ea   :  { %v1345_v31 = vpop.f32.mrf.mxu1 }
 0x4eb   :  { %v894_v0 = vadd.f32 %v891_v29, %v814_v28 }
 0x4ed   :  { %vm896_vm5 = vcmp.gt.f32.partialorder %v894_v0, 0.0  ;;  %v898_v32 = vmul.f32 %v897_v30, %v894_v0 }
 0x4ef   :  { %v899_v33 = vsel %vm896_vm5, %v894_v0, %v898_v32 }
 0x4f0   :  { %v900_v34 = vpack.c.bf16 %v899_v33, %v899_v33 }
 0x4f2   :  { %1363 = vmatmul.mubr.bf16.vlgmr.msra.gmra.mxu1 %v900_v34 }
 0x5b2   :  { %v1006_v36 = vpop.f32.mrf.mxu1 }
 0x5b3   :  { %v1007_v37 = vadd.f32 %v1052_v35, %v1006_v36 }
 0x5b4   :  { %v1364_v38 = vpop.f32.mrf.mxu1 }
 0x5b5   :  { %1012 = vst [vmem:[#allocation9] sm:$0xff] %v1007_v37 }
 0x5b6   :  { %v1009_v39 = vpop.f32.mrf.mxu1 }
 0x5b7   :  { %1446 = shalt.err (!%p1443_p0)
}
 0x5b8   :  { %1022 = dma.vmem_to_hbm [thread:$0]  %s1020_s10, 128, %s1907_s14, [#allocation6]   ;;  %v1365_v40 = vpop.f32.mrf.mxu1 }
 0x5b9   :  { %1459 = dma.done.wait [#allocation6], 128  }
 0x5ba   :  { %1460 = vsyncadd [#allocation6], 4294967168 }
 0x5bb   :  { %1026 = vsyncpa [#allocation5], 1 }
 0x5bc   :  { %1027 = vsyncpa [#allocation8], 1 }
 0x5bd   :  { %1028 = vsyncpa [#allocation6], 1 }

// kernel: tpu_custom_call.1
= control target key start
LH: loop header
LB: loop body
LE: loop exit
PB: predicated region body
PF: predicated region fallthrough
CT: control target
= control target key end

     0   :  { %21 = vsyncpa [#allocation5], 0  ;;  %s1893_s0 = inlined_call_operand.vmem [shape: f32[8,32], index: 0, kind: input, shape index: {}]   ;;  %s1894_s1 = inlined_call_operand.vmem [shape: f32[128,4], index: 1, kind: input, shape index: {}]   ;;  %s1895_s2 = inlined_call_operand.hbm [shape: f32[4,128], index: 2, kind: input, shape index: {}]   ;;  %s1896_s3 = inlined_call_operand.vmem [shape: f32[4,128], index: 3, kind: input, shape index: {}]   ;;  %s1897_s4 = inlined_call_operand.hbm [shape: bf16[32,128], index: 4, kind: input, shape index: {}]   ;;  %s1898_s5 = inlined_call_operand.vmem [shape: f32[1,128], index: 5, kind: input, shape index: {}]   ;;  %s1899_s6 = inlined_call_operand.vmem [shape: f32[1,128], index: 6, kind: input, shape index: {}]   ;;  %s1900_s7 = inlined_call_operand.<no memory space> [shape: f32[1,1], index: 7, kind: input, shape index: {}]   ;;  %s1901_s8 = inlined_call_operand.vmem [shape: bf16[128,128], index: 8, kind: input, shape index: {}]   ;;  %s1902_s9 = inlined_call_operand.vmem [shape: f32[1,128], index: 9, kind: input, shape index: {}]   ;;  %s1903_s10 = inlined_call_operand.vmem [shape: f32[1,128], index: 10, kind: input, shape index: {}]   ;;  %s1904_s11 = inlined_call_operand.<no memory space> [shape: f32[1,1], index: 11, kind: input, shape index: {}]   ;;  %s1905_s12 = inlined_call_operand.vmem [shape: bf16[128,128], index: 12, kind: input, shape index: {}]   ;;  %s1906_s13 = inlined_call_operand.vmem [shape: f32[1,128], index: 13, kind: input, shape index: {}]   ;;  %s1907_s14 = inlined_call_operand.hbm [shape: f32[8,128], index: 14, kind: output, shape index: {}]  }
   0x1   :  { %22 = vsyncpa [#allocation8], 0 }
   0x2   :  { %23 = vsyncpa [#allocation6], 0  ;;  %s1461_s29 = smov [#allocation4]   ;;  %s1462_s15 = smov [#allocation7]  }
   0x3   :  { %s34_s30 = sshll.u32 %s1461_s29, 4  ;;  %s45_s16 = sshll.u32 %s1462_s15, 4  ;;  %s35_s30 = int_to_ptr.vmem [resolvable:$true] %s34_s30  ;;  %s46_s16 = int_to_ptr.vmem [resolvable:$true] %s45_s16 }
   0x4   :  { %s1403_s17 = scalar_lea.vmem %s35_s30, 64  ;;  %p1408_p1 = scmp.lt.s32.totalorder %s35_s30, %s35_s30 }
   0x5   :  { %p1404_p0 = scmp.ne.s32.totalorder %s35_s30, %s1403_s17  ;;  %p1409_p2 = scmp.lt.s32.totalorder %s1403_s17, %s1403_s17 }
   0x7   :  { %p1410_p3 = por %p1409_p2, %p1408_p1 }
   0x9   :  { %p1411_p4 = pnand %p1410_p3, %p1404_p0 }
   0xb   :  { %1414 = shalt.err (!%p1411_p4)
}
   0xc   :  { %37 = dma.hbm_to_vmem [thread:$0]  %s1895_s2, 64, %s35_s30, [#allocation5]  }
   0xd   :  { %s1423_s20 = scalar_lea.vmem %s46_s16, 256  ;;  %p1428_p6 = scmp.lt.s32.totalorder %s46_s16, %s46_s16 }
   0xe   :  { %p1424_p5 = scmp.ne.s32.totalorder %s46_s16, %s1423_s20  ;;  %p1429_p7 = scmp.lt.s32.totalorder %s1423_s20, %s1423_s20 }
  0x10   :  { %p1430_p8 = por %p1429_p7, %p1428_p6 }
  0x12   :  { %p1431_p9 = pnand %p1430_p8, %p1424_p5 }
  0x14   :  { %1434 = shalt.err (!%p1431_p9)
}
  0x15   :  { %s1463_s21 = smov 64   ;;  %s1464_s22 = smov 4  }
  0x16   :  { %51 = dma.hbm_to_vmem [thread:$0]  %s1897_s4, 256, %s46_s16, [#allocation8], %s1463_s21, %s1463_s21, %s1464_s22  }
  0x17   :  { %1455 = dma.done.wait [#allocation5], 64  }
  0x18   :  { %1456 = vsyncadd [#allocation5], 4294967232 }
  0x19   :  { %1457 = dma.done.wait [#allocation8], 256  }
  0x1a   :  { %1458 = vsyncadd [#allocation8], 4294967040  ;;  %v1465_v0 = vmov 0.0   ;;  %vm1466_vm0 = vmmov 0   ;;  %v1373_v1 = vld [vmem:[#allocation7 + $0x8] sm:$0xff]   ;;  %v1374_v2 = vld [vmem:[#allocation7] sm:$0xff]   ;;  %v473_v54 = vstv %s1900_s7 }
  0x1b   :  { %1158 = vmatprep.subr.bf16.mxu0 %v1465_v0  ;;  %1162 = vmatprep.mubr.msk.bf16.mxu0 %vm1466_vm0, %v1465_v0  ;;  %v93_v3 = vld [vmem:[%s1893_s0] sm:$0xff]  ;;  %v1561_v4 = vld [vmem:[%s1894_s1 + $0x78] sm:$0xff]  ;;  %v1566_v5 = vld [vmem:[%s1894_s1 + $0x70] sm:$0xff]  ;;  %vm118_vm1 = vcmask 261120   ;;  %vm314_vm2 = vcmask 1043456   ;;  %vm310_vm3 = vcmask 31744  }
  0x1c   :  { %1166 = vmatprep.subr.mxu1 %v1465_v0  ;;  %1198 = vmatprep.mubr.msk.f32.mxu1 %vm1466_vm0, %v1465_v0  ;;  %v1574_v6 = vld [vmem:[%s1894_s1 + $0x68] sm:$0xff]  ;;  %v94_v7 = vpack.c.bf16 %v93_v3, %v93_v3  ;;  %v1581_v8 = vld [vmem:[%s1894_s1 + $0x60] sm:$0xff]  ;;  %v1588_v9 = vld [vmem:[%s1894_s1 + $0x58] sm:$0xff]  ;;  %s1467_s21 = smov [#allocation9]  }
  0x1d   :  { %1159 = vmatpush3.bf16.msra.mxu0 %v1373_v1  ;;  %1167 = vmatpush3.msra.mxu1 %v1561_v4  ;;  %v1594_v10 = vld [vmem:[%s1894_s1 + $0x50] sm:$0xff]  ;;  %v1602_v11 = vld [vmem:[%s1894_s1 + $0x48] sm:$0xff]  ;;  %v1611_v12 = vld [vmem:[%s1894_s1 + $0x40] sm:$0xff] }
  0x1e   :  { %1160 = vmatprep.subr.bf16.mxu0 %v1465_v0  ;;  %1168 = vmatprep.subr.mxu1 %v1465_v0  ;;  %v1620_v13 = vld [vmem:[%s1894_s1 + $0x38] sm:$0xff]  ;;  %v1633_v14 = vld [vmem:[%s1894_s1 + $0x30] sm:$0xff]  ;;  %v1642_v15 = vld [vmem:[%s1894_s1 + $0x28] sm:$0xff] }
  0x1f   :  { %1169 = vmatpush3.msra.mxu1 %v1566_v5  ;;  %v1651_v16 = vld [vmem:[%s1894_s1 + $0x20] sm:$0xff]  ;;  %v1660_v17 = vld [vmem:[%s1894_s1 + $0x18] sm:$0xff]  ;;  %v1669_v18 = vld [vmem:[%s1894_s1 + $0x10] sm:$0xff] }
  0x20   :  { %1170 = vmatprep.subr.mxu1 %v1465_v0  ;;  %v1691_v19 = vld [vmem:[%s1894_s1 + $0x8] sm:$0xff]  ;;  %v1699_v20 = vld [vmem:[%s1894_s1] sm:$0xff]  ;;  %v1375_v37 = vld [vmem:[%s1901_s8 + $0x38] sm:$0xff]  }
  0x21   :  { %1161 = vmatpush3.bf16.msra.mxu0 %v1374_v2  ;;  %1171 = vmatpush3.msra.mxu1 %v1574_v6  ;;  %v1029_v21 = vld [vmem:[%s1898_s5] ss:$0 sm:$0xff]  ;;  %v1376_v41 = vld [vmem:[%s1901_s8 + $0x30] sm:$0xff]   ;;  %v1377_v42 = vld [vmem:[%s1901_s8 + $0x28] sm:$0xff]  }
  0x22   :  { %1201 = vmatprep.subr.mxu0 %v1465_v0  ;;  %1172 = vmatprep.subr.mxu1 %v1465_v0  ;;  %v162_v28 = vld [vmem:[#allocation4] sm:$0xf]  ;;  %v1379_v44 = vld [vmem:[%s1901_s8 + $0x18] sm:$0xff]   ;;  %v1380_v45 = vld [vmem:[%s1901_s8 + $0x10] sm:$0xff]  }
  0x23   :  { %1173 = vmatpush3.msra.mxu1 %v1581_v8  ;;  %v1378_v43 = vld [vmem:[%s1901_s8 + $0x20] sm:$0xff]   ;;  %v1381_v46 = vld [vmem:[%s1901_s8 + $0x8] sm:$0xff]  }
  0x24   :  { %1163 = vmatmul.mubr.msk.bf16.vlgmr.msra.gmra.mxu0 %vm118_vm1, %v94_v7  ;;  %1174 = vmatprep.subr.mxu1 %v1465_v0  ;;  %v1382_v47 = vld [vmem:[%s1901_s8] sm:$0xff]  }
  0x25   :  { %1202 = vmatpush3.msra.mxu0 %v1561_v4  ;;  %1175 = vmatpush3.msra.mxu1 %v1588_v9  ;;  %v1035_v49 = vld [vmem:[%s1899_s6] ss:$0 sm:$0xff] }
  0x26   :  { %1203 = vmatprep.subr.mxu0 %v1465_v0  ;;  %1176 = vmatprep.subr.mxu1 %v1465_v0  ;;  %v1038_v60 = vld [vmem:[%s1902_s9] ss:$0 sm:$0xff] }
  0x27   :  { %1204 = vmatpush3.msra.mxu0 %v1566_v5  ;;  %1177 = vmatpush3.msra.mxu1 %v1594_v10 }
  0x28   :  { %1205 = vmatprep.subr.mxu0 %v1465_v0  ;;  %1178 = vmatprep.subr.mxu1 %v1465_v0 }
  0x29   :  { %1206 = vmatpush3.msra.mxu0 %v1574_v6  ;;  %1179 = vmatpush3.msra.mxu1 %v1602_v11 }
  0x2a   :  { %1207 = vmatprep.subr.mxu0 %v1465_v0  ;;  %1180 = vmatprep.subr.mxu1 %v1465_v0 }
  0x2b   :  { %1208 = vmatpush3.msra.mxu0 %v1581_v8  ;;  %1181 = vmatpush3.msra.mxu1 %v1611_v12 }
  0x2c   :  { %1209 = vmatprep.subr.mxu0 %v1465_v0  ;;  %1182 = vmatprep.subr.mxu1 %v1465_v0 }
  0x2d   :  { %1210 = vmatpush3.msra.mxu0 %v1588_v9  ;;  %1183 = vmatpush3.msra.mxu1 %v1620_v13 }
  0x2e   :  { %1211 = vmatprep.subr.mxu0 %v1465_v0  ;;  %1184 = vmatprep.subr.mxu1 %v1465_v0 }
  0x2f   :  { %1212 = vmatpush3.msra.mxu0 %v1594_v10  ;;  %1185 = vmatpush3.msra.mxu1 %v1633_v14 }
  0x30   :  { %1213 = vmatprep.subr.mxu0 %v1465_v0  ;;  %1186 = vmatprep.subr.mxu1 %v1465_v0 }
  0x31   :  { %1214 = vmatpush3.msra.mxu0 %v1602_v11  ;;  %1187 = vmatpush3.msra.mxu1 %v1642_v15 }
  0x32   :  { %1215 = vmatprep.subr.mxu0 %v1465_v0  ;;  %1188 = vmatprep.subr.mxu1 %v1465_v0 }
  0x33   :  { %1216 = vmatpush3.msra.mxu0 %v1611_v12  ;;  %1189 = vmatpush3.msra.mxu1 %v1651_v16 }
  0x34   :  { %1217 = vmatprep.subr.mxu0 %v1465_v0  ;;  %1190 = vmatprep.subr.mxu1 %v1465_v0 }
  0x35   :  { %1218 = vmatpush3.msra.mxu0 %v1620_v13  ;;  %1191 = vmatpush3.msra.mxu1 %v1660_v17 }
  0x36   :  { %1219 = vmatprep.subr.mxu0 %v1465_v0  ;;  %1192 = vmatprep.subr.mxu1 %v1465_v0 }
  0x37   :  { %1220 = vmatpush3.msra.mxu0 %v1633_v14  ;;  %1193 = vmatpush3.msra.mxu1 %v1669_v18 }
  0x38   :  { %1221 = vmatprep.subr.mxu0 %v1465_v0  ;;  %1194 = vmatprep.subr.mxu1 %v1465_v0 }
  0x39   :  { %1222 = vmatpush3.msra.mxu0 %v1642_v15  ;;  %1233 = vmatprep.mubr.msk.f32.mxu0 %vm1466_vm0, %v1465_v0 }
  0x3a   :  { %1223 = vmatprep.subr.mxu0 %v1465_v0  ;;  %1195 = vmatpush3.msra.mxu1 %v1691_v19 }
  0x3b   :  { %1224 = vmatpush3.msra.mxu0 %v1651_v16  ;;  %1196 = vmatprep.subr.mxu1 %v1465_v0 }
  0x3c   :  { %1225 = vmatprep.subr.mxu0 %v1465_v0  ;;  %1197 = vmatpush3.msra.mxu1 %v1699_v20 }
  0x3d   :  { %1226 = vmatpush3.msra.mxu0 %v1660_v17  ;;  %1241 = vmatprep.subr.mxu1 %v1465_v0 }
  0x3e   :  { %1227 = vmatprep.subr.mxu0 %v1465_v0 }
  0x3f   :  { %1228 = vmatpush3.msra.mxu0 %v1669_v18 }
  0x40   :  { %1229 = vmatprep.subr.mxu0 %v1465_v0 }
  0x41   :  { %1230 = vmatpush3.msra.mxu0 %v1691_v19 }
  0x42   :  { %1231 = vmatprep.subr.mxu0 %v1465_v0 }
  0x43   :  { %1232 = vmatpush3.msra.mxu0 %v1699_v20 }
  0x44   :  { %1236 = vmatprep.subr.mxu0 %v1465_v0 }
  0xe4   :  { %v156_v22 = vpop.f32.mrf.mxu0 }
  0xe5   :  { %v1709_v23 = vadd.f32 %v1029_v21, %v156_v22  ;;  %v1388_v21 = vld [vmem:[%s1905_s12 + $0x10] sm:$0xff]   ;;  %v1389_v22 = vld [vmem:[%s1905_s12 + $0x8] sm:$0xff]  }
  0xe6   :  { %v1164_v24 = vpop.f32.mrf.mxu0 }
  0xe7   :  { %v234_v25 = vmul.f32 %v1709_v23, %v1709_v23  ;;  %1199 = vmatmul.mubr.f32.vlgmr.msra.gmra.mxu1 %v1709_v23 }
  0xe8   :  { %v159_v26 = vpop.f32.mrf.mxu0  ;;  %1243 = vmatprep.mubr.msk.f32.mxu1 %vm1466_vm0, %v1465_v0  ;;  %1242 = vmatpush3.msk.msra.mxu1 %vm314_vm2, %v162_v28 }
  0xe9   :  { %1234 = vmatmul.mubr.f32.vlgmr.msra.gmra.mxu0 %v234_v25  ;;  %1266 = vmatprep.subr.mxu1 %v1465_v0  ;;  %v1049_v26 = vld [vmem:[%s1903_s10] ss:$0 sm:$0xff]  ;;  %s1019_s10 = sshll.u32 %s1467_s21, 4  ;;  %s1020_s10 = int_to_ptr.vmem [resolvable:$true] %s1019_s10 }
  0xea   :  { %v1165_v27 = vpop.f32.mrf.mxu0  ;;  %1238 = vmatprep.mubr.msk.f32.mxu0 %vm1466_vm0, %v1465_v0  ;;  %1237 = vmatpush3.msk.msra.mxu0 %vm314_vm2, %v162_v28  ;;  %p1440_p11 = scmp.lt.s32.totalorder %s1020_s10, %s1020_s10 }
  0xeb   :  { %1246 = vmatprep.subr.bf16.mxu0 %v1465_v0 }
 0x1a7   :  { %v230_v29 = vpop.f32.mrf.mxu1 }
 0x1a8   :  { %v305_v30 = vmul.f32 %v230_v29, %v230_v29  ;;  %v388_v38 = vsub.f32 0.0, %v230_v29 }
 0x1a9   :  { %v1200_v31 = vpop.f32.mrf.mxu1  ;;  %v301_v32 = vpop.f32.mrf.mxu0 }
 0x1aa   :  { %v306_v33 = vsub.f32 %v301_v32, %v305_v30  ;;  %v897_v30 = vstv %s1904_s11  ;;  %s1435_s11 = scalar_lea.vmem %s1020_s10, 128 }
 0x1ab   :  { %v1235_v34 = vpop.f32.mrf.mxu0  ;;  %p1436_p10 = scmp.ne.s32.totalorder %s1020_s10, %s1435_s11  ;;  %p1441_p12 = scmp.lt.s32.totalorder %s1435_s11, %s1435_s11 }
 0x1ac   :  { %v307_v35 = vmax.f32 %v306_v33, 0.0 }
 0x1ad   :  { %p1442_p13 = por %p1441_p12, %p1440_p11 }
 0x1ae   :  { %v308_v36 = vadd.f32 1e-05, %v307_v35  ;;  %v1052_v35 = vld [vmem:[%s1906_s13] ss:$0 sm:$0xff] }
 0x1af   :  { %p1443_p0 = pnand %p1442_p13, %p1436_p10 }
 0x1b0   :  { %1391 = vrsqrt.f32 %v308_v36 }
 0x1bd   :  { %v1392_v39 = vpop.eup %1391 }
 0x1be   :  { %1239 = vmatmul.mubr.msk.f32.vlgmr.msra.gmra.mxu0 %vm310_vm3, %v1392_v39  ;;  %v389_v40 = vmul.f32 %v1392_v39, %v388_v38 }
 0x1bf   :  { %1247 = vmatpush3.bf16.msra.mxu0 %v1375_v37  ;;  %1262 = vmatprep.mubr.msk.bf16.mxu0 %vm1466_vm0, %v1465_v0 }
 0x1c0   :  { %1244 = vmatmul.mubr.msk.f32.vlgmr.msra.gmra.mxu1 %vm310_vm3, %v389_v40  ;;  %1248 = vmatprep.subr.bf16.mxu0 %v1465_v0 }
 0x1c1   :  { %1267 = vmatpush3.msra.mxu1 %v1561_v4  ;;  %1298 = vmatprep.mubr.msk.f32.mxu1 %vm1466_vm0, %v1465_v0 }
 0x1c2   :  { %1268 = vmatprep.subr.mxu1 %v1465_v0 }
 0x1c3   :  { %1249 = vmatpush3.bf16.msra.mxu0 %v1376_v41  ;;  %1269 = vmatpush3.msra.mxu1 %v1566_v5 }
 0x1c4   :  { %1250 = vmatprep.subr.bf16.mxu0 %v1465_v0  ;;  %1270 = vmatprep.subr.mxu1 %v1465_v0 }
 0x1c5   :  { %1271 = vmatpush3.msra.mxu1 %v1574_v6 }
 0x1c6   :  { %1272 = vmatprep.subr.mxu1 %v1465_v0 }
 0x1c7   :  { %1251 = vmatpush3.bf16.msra.mxu0 %v1377_v42  ;;  %1273 = vmatpush3.msra.mxu1 %v1581_v8 }
 0x1c8   :  { %1252 = vmatprep.subr.bf16.mxu0 %v1465_v0  ;;  %1274 = vmatprep.subr.mxu1 %v1465_v0 }
 0x1c9   :  { %1275 = vmatpush3.msra.mxu1 %v1588_v9 }
 0x1ca   :  { %1276 = vmatprep.subr.mxu1 %v1465_v0 }
 0x1cb   :  { %1253 = vmatpush3.bf16.msra.mxu0 %v1378_v43  ;;  %1277 = vmatpush3.msra.mxu1 %v1594_v10 }
 0x1cc   :  { %1254 = vmatprep.subr.bf16.mxu0 %v1465_v0  ;;  %1278 = vmatprep.subr.mxu1 %v1465_v0 }
 0x1cd   :  { %1279 = vmatpush3.msra.mxu1 %v1602_v11 }
 0x1ce   :  { %1280 = vmatprep.subr.mxu1 %v1465_v0 }
 0x1cf   :  { %1255 = vmatpush3.bf16.msra.mxu0 %v1379_v44  ;;  %1281 = vmatpush3.msra.mxu1 %v1611_v12 }
 0x1d0   :  { %1256 = vmatprep.subr.bf16.mxu0 %v1465_v0  ;;  %1282 = vmatprep.subr.mxu1 %v1465_v0 }
 0x1d1   :  { %1283 = vmatpush3.msra.mxu1 %v1620_v13 }
 0x1d2   :  { %1284 = vmatprep.subr.mxu1 %v1465_v0 }
 0x1d3   :  { %1285 = vmatpush3.msra.mxu1 %v1633_v14  ;;  %1257 = vmatpush3.bf16.msra.mxu0 %v1380_v45 }
 0x1d4   :  { %1286 = vmatprep.subr.mxu1 %v1465_v0  ;;  %1258 = vmatprep.subr.bf16.mxu0 %v1465_v0 }
 0x1d5   :  { %1287 = vmatpush3.msra.mxu1 %v1642_v15 }
 0x1d6   :  { %1288 = vmatprep.subr.mxu1 %v1465_v0 }
 0x1d7   :  { %1289 = vmatpush3.msra.mxu1 %v1651_v16  ;;  %1259 = vmatpush3.bf16.msra.mxu0 %v1381_v46 }
 0x1d8   :  { %1290 = vmatprep.subr.mxu1 %v1465_v0  ;;  %1260 = vmatprep.subr.bf16.mxu0 %v1465_v0 }
 0x1d9   :  { %1291 = vmatpush3.msra.mxu1 %v1660_v17 }
 0x1da   :  { %1292 = vmatprep.subr.mxu1 %v1465_v0 }
 0x1db   :  { %1293 = vmatpush3.msra.mxu1 %v1669_v18  ;;  %1261 = vmatpush3.bf16.msra.mxu0 %v1382_v47 }
 0x1dc   :  { %1294 = vmatprep.subr.mxu1 %v1465_v0  ;;  %1301 = vmatprep.subr.mxu0 %v1465_v0 }
 0x1dd   :  { %1295 = vmatpush3.msra.mxu1 %v1691_v19 }
 0x1de   :  { %1296 = vmatprep.subr.mxu1 %v1465_v0 }
 0x1df   :  { %1297 = vmatpush3.msra.mxu1 %v1699_v20 }
 0x1e0   :  { %1336 = vmatprep.subr.mxu1 %v1465_v0 }
 0x27e   :  { %v384_v48 = vpop.f32.mrf.mxu0 }
 0x27f   :  { %v390_v52 = vmul.f32 %v384_v48, %v1709_v23  ;;  %v1390_v23 = vld [vmem:[%s1905_s12] sm:$0xff]  }
 0x280   :  { %v1240_v50 = vpop.f32.mrf.mxu0  ;;  %v466_v51 = vpop.f32.mrf.mxu1 }
 0x281   :  { %v467_v53 = vadd.f32 %v1035_v49, %v466_v51 }
 0x282   :  { %v1245_v55 = vpop.f32.mrf.mxu1 }
 0x283   :  { %v470_v56 = vadd.f32 %v467_v53, %v390_v52 }
 0x285   :  { %vm472_vm4 = vcmp.gt.f32.partialorder %v470_v56, 0.0  ;;  %v474_v57 = vmul.f32 %v473_v54, %v470_v56 }
 0x287   :  { %v475_v58 = vsel %vm472_vm4, %v470_v56, %v474_v57 }
 0x288   :  { %v476_v59 = vpack.c.bf16 %v475_v58, %v475_v58 }
 0x28a   :  { %1263 = vmatmul.mubr.bf16.vlgmr.msra.gmra.mxu0 %v476_v59 }
 0x28b   :  { %1302 = vmatpush3.msra.mxu0 %v1561_v4  ;;  %1333 = vmatprep.mubr.msk.f32.mxu0 %vm1466_vm0, %v1465_v0  ;;  %v588_v4 = vld [vmem:[%s1896_s3] sm:$0xf] }
 0x28c   :  { %1303 = vmatprep.subr.mxu0 %v1465_v0 }
 0x28d   :  { %1304 = vmatpush3.msra.mxu0 %v1566_v5 }
 0x28e   :  { %1305 = vmatprep.subr.mxu0 %v1465_v0 }
 0x28f   :  { %1306 = vmatpush3.msra.mxu0 %v1574_v6 }
 0x290   :  { %1307 = vmatprep.subr.mxu0 %v1465_v0 }
 0x291   :  { %1308 = vmatpush3.msra.mxu0 %v1581_v8 }
 0x292   :  { %1309 = vmatprep.subr.mxu0 %v1465_v0 }
 0x293   :  { %1310 = vmatpush3.msra.mxu0 %v1588_v9 }
 0x294   :  { %1311 = vmatprep.subr.mxu0 %v1465_v0 }
 0x295   :  { %1312 = vmatpush3.msra.mxu0 %v1594_v10 }
 0x296   :  { %1313 = vmatprep.subr.mxu0 %v1465_v0 }
 0x297   :  { %1314 = vmatpush3.msra.mxu0 %v1602_v11 }
 0x298   :  { %1315 = vmatprep.subr.mxu0 %v1465_v0 }
 0x299   :  { %1316 = vmatpush3.msra.mxu0 %v1611_v12 }
 0x29a   :  { %1317 = vmatprep.subr.mxu0 %v1465_v0 }
 0x29b   :  { %1318 = vmatpush3.msra.mxu0 %v1620_v13 }
 0x29c   :  { %1319 = vmatprep.subr.mxu0 %v1465_v0 }
 0x29d   :  { %1320 = vmatpush3.msra.mxu0 %v1633_v14 }
 0x29e   :  { %1321 = vmatprep.subr.mxu0 %v1465_v0 }
 0x29f   :  { %1322 = vmatpush3.msra.mxu0 %v1642_v15  ;;  %v1383_v15 = vld [vmem:[%s1905_s12 + $0x38] sm:$0xff]  }
 0x2a0   :  { %1323 = vmatprep.subr.mxu0 %v1465_v0 }
 0x2a1   :  { %1324 = vmatpush3.msra.mxu0 %v1651_v16 }
 0x2a2   :  { %1325 = vmatprep.subr.mxu0 %v1465_v0 }
 0x2a3   :  { %1326 = vmatpush3.msra.mxu0 %v1660_v17  ;;  %v1384_v17 = vld [vmem:[%s1905_s12 + $0x30] sm:$0xff]  }
 0x2a4   :  { %1327 = vmatprep.subr.mxu0 %v1465_v0 }
 0x2a5   :  { %1328 = vmatpush3.msra.mxu0 %v1669_v18  ;;  %v1385_v18 = vld [vmem:[%s1905_s12 + $0x28] sm:$0xff]  }
 0x2a6   :  { %1329 = vmatprep.subr.mxu0 %v1465_v0 }
 0x2a7   :  { %1330 = vmatpush3.msra.mxu0 %v1691_v19  ;;  %v1386_v19 = vld [vmem:[%s1905_s12 + $0x20] sm:$0xff]  }
 0x2a8   :  { %1331 = vmatprep.subr.mxu0 %v1465_v0 }
 0x2a9   :  { %1332 = vmatpush3.msra.mxu0 %v1699_v20  ;;  %v1387_v20 = vld [vmem:[%s1905_s12 + $0x18] sm:$0xff]  }
 0x34a   :  { %v582_v61 = vpop.f32.mrf.mxu0 }
 0x34b   :  { %v583_v62 = vadd.f32 %v1038_v60, %v582_v61 }
 0x34c   :  { %v1264_v63 = vpop.f32.mrf.mxu0 }
 0x34d   :  { %v660_v1 = vmul.f32 %v583_v62, %v583_v62  ;;  %1299 = vmatmul.mubr.f32.vlgmr.msra.gmra.mxu1 %v583_v62 }
 0x34e   :  { %v585_v2 = vpop.f32.mrf.mxu0  ;;  %1338 = vmatprep.mubr.msk.f32.mxu1 %vm1466_vm0, %v1465_v0  ;;  %1337 = vmatpush3.msk.msra.mxu1 %vm314_vm2, %v588_v4 }
 0x34f   :  { %1334 = vmatmul.mubr.f32.vlgmr.msra.gmra.mxu0 %v660_v1  ;;  %1341 = vmatprep.subr.mxu1 %v1465_v0 }
 0x350   :  { %v1265_v3 = vpop.f32.mrf.mxu0 }
 0x40d   :  { %v656_v5 = vpop.f32.mrf.mxu1 }
 0x40e   :  { %v731_v6 = vmul.f32 %v656_v5, %v656_v5  ;;  %v812_v14 = vsub.f32 0.0, %v656_v5 }
 0x40f   :  { %v1300_v7 = vpop.f32.mrf.mxu1  ;;  %v727_v8 = vpop.f32.mrf.mxu0 }
 0x410   :  { %v732_v9 = vsub.f32 %v727_v8, %v731_v6 }
 0x411   :  { %v1335_v10 = vpop.f32.mrf.mxu0 }
 0x412   :  { %v733_v11 = vmax.f32 %v732_v9, 0.0 }
 0x414   :  { %v734_v12 = vadd.f32 1e-05, %v733_v11 }
 0x416   :  { %1393 = vrsqrt.f32 %v734_v12 }
 0x423   :  { %v1394_v13 = vpop.eup %1393 }
 0x424   :  { %1339 = vmatmul.mubr.msk.f32.vlgmr.msra.gmra.mxu1 %vm310_vm3, %v1394_v13  ;;  %v813_v16 = vmul.f32 %v1394_v13, %v812_v14 }
 0x425   :  { %1342 = vmatpush3.msk.msra.mxu1 %vm314_vm2, %v588_v4  ;;  %1343 = vmatprep.mubr.msk.f32.mxu1 %vm1466_vm0, %v1465_v0 }
 0x426   :  { %1346 = vmatprep.subr.bf16.mxu1 %v1465_v0 }
 0x428   :  { %1344 = vmatmul.mubr.msk.f32.vlgmr.msra.gmra.mxu1 %vm310_vm3, %v813_v16 }
 0x429   :  { %1347 = vmatpush3.bf16.msra.mxu1 %v1383_v15  ;;  %1362 = vmatprep.mubr.msk.bf16.mxu1 %vm1466_vm0, %v1465_v0 }
 0x42a   :  { %1348 = vmatprep.subr.bf16.mxu1 %v1465_v0 }
 0x42d   :  { %1349 = vmatpush3.bf16.msra.mxu1 %v1384_v17 }
 0x42e   :  { %1350 = vmatprep.subr.bf16.mxu1 %v1465_v0 }
 0x431   :  { %1351 = vmatpush3.bf16.msra.mxu1 %v1385_v18 }
 0x432   :  { %1352 = vmatprep.subr.bf16.mxu1 %v1465_v0 }
 0x435   :  { %1353 = vmatpush3.bf16.msra.mxu1 %v1386_v19 }
 0x436   :  { %1354 = vmatprep.subr.bf16.mxu1 %v1465_v0 }
 0x439   :  { %1355 = vmatpush3.bf16.msra.mxu1 %v1387_v20 }
 0x43a   :  { %1356 = vmatprep.subr.bf16.mxu1 %v1465_v0 }
 0x43d   :  { %1357 = vmatpush3.bf16.msra.mxu1 %v1388_v21 }
 0x43e   :  { %1358 = vmatprep.subr.bf16.mxu1 %v1465_v0 }
 0x441   :  { %1359 = vmatpush3.bf16.msra.mxu1 %v1389_v22 }
 0x442   :  { %1360 = vmatprep.subr.bf16.mxu1 %v1465_v0 }
 0x445   :  { %1361 = vmatpush3.bf16.msra.mxu1 %v1390_v23 }
 0x4e4   :  { %v808_v24 = vpop.f32.mrf.mxu1 }
 0x4e5   :  { %v814_v28 = vmul.f32 %v808_v24, %v583_v62 }
 0x4e6   :  { %v1340_v25 = vpop.f32.mrf.mxu1 }
 0x4e8   :  { %v890_v27 = vpop.f32.mrf.mxu1 }
 0x4e9   :  { %v891_v29 = vadd.f32 %v1049_v26, %v890_v27 }
 0x4ea   :  { %v1345_v31 = vpop.f32.mrf.mxu1 }
 0x4eb   :  { %v894_v0 = vadd.f32 %v891_v29, %v814_v28 }
 0x4ed   :  { %vm896_vm5 = vcmp.gt.f32.partialorder %v894_v0, 0.0  ;;  %v898_v32 = vmul.f32 %v897_v30, %v894_v0 }
 0x4ef   :  { %v899_v33 = vsel %vm896_vm5, %v894_v0, %v898_v32 }
 0x4f0   :  { %v900_v34 = vpack.c.bf16 %v899_v33, %v899_v33 }
 0x4f2   :  { %1363 = vmatmul.mubr.bf16.vlgmr.msra.gmra.mxu1 %v900_v34 }
 0x5b2   :  { %v1006_v36 = vpop.f32.mrf.mxu1 }
 0x5b3   :  { %v1007_v37 = vadd.f32 %v1052_v35, %v1006_v36 }
 0x5b4   :  { %v1364_v38 = vpop.f32.mrf.mxu1 }
 0x5b5   :  { %1012 = vst [vmem:[#allocation9] sm:$0xff] %v1007_v37 }
 0x5b6   :  { %v1009_v39 = vpop.f32.mrf.mxu1 }
 0x5b7   :  { %1446 = shalt.err (!%p1443_p0)
}
 0x5b8   :  { %1022 = dma.vmem_to_hbm [thread:$0]  %s1020_s10, 128, %s1907_s14, [#allocation6]   ;;  %v1365_v40 = vpop.f32.mrf.mxu1 }
 0x5b9   :  { %1459 = dma.done.wait [#allocation6], 128  }
 0x5ba   :  { %1460 = vsyncadd [#allocation6], 4294967168 }
 0x5bb   :  { %1026 = vsyncpa [#allocation5], 1 }
 0x5bc   :  { %1027 = vsyncpa [#allocation8], 1 }
 0x5bd   :  { %1028 = vsyncpa [#allocation6], 1 }

</bundles_post_ra>
